<compile_context>
chip_gen: v6e
topology: v6e:2x2x1
jax: 0.10.0
libtpu: 0.0.40
codegen_flags: <defaults>
</compile_context>

<pallas_src>
import jax
import jax.numpy as jnp
from jax import lax
from jax.experimental import pallas as pl
from jax.experimental.pallas import tpu as pltpu

# ---------------- config (small synthetic "roberta-base"-shaped model) --------
VOCAB = 50
B, S = 2, 8
H = 64
NUM_HEADS = 4
HEAD_DIM = H // NUM_HEADS
FFN = 128
LAYERS = 2
NUM_LABELS = 3
NLAB_PAD = 128              # classifier logits padded to a full 128-lane tile
LN_EPS = 1e-5

_NT = (((1,), (1,)), ((), ()))   # dot_general dims: contract last of both (A @ B^T)


def _layernorm(x, g, b):
    mu = jnp.mean(x, axis=-1, keepdims=True)
    var = jnp.mean(jnp.square(x - mu), axis=-1, keepdims=True)
    return (x - mu) * lax.rsqrt(var + LN_EPS) * g + b


# ------------- fused encoder + classifier + weighted-CE kernel -----------------
def encoder_kernel(x_emb_ref, embg_ref, embb_ref, mask_ref,
                   wqkv_ref, bqkv_ref, wo_ref, bo_ref, ln1g_ref, ln1b_ref,
                   w1_ref, b1_ref, w2_ref, b2_ref, ln2g_ref, ln2b_ref,
                   clsw_ref, clsb_ref, labels_ref, cw_ref,
                   logits_ref, num_ref, den_ref,
                   x_scr):
    b = pl.program_id(0)                 # batch (parallel) axis
    l = pl.program_id(1)                 # layer (arbitrary) axis
    last_l = pl.num_programs(1) - 1

    # Layer step 0: fuse the embedding LayerNorm and seed the VMEM-resident carry.
    @pl.when(l == 0)
    def _():
        x_scr[...] = _layernorm(x_emb_ref[...].astype(jnp.float32),
                                embg_ref[...], embb_ref[...])

    x = x_scr[...]                                                   # (S, H) f32

    # Key-padding additive bias rebuilt in-kernel from the (1, S) mask row
    # (no materialized (BS, BS) bias matrix).
    key_bias = jnp.where(mask_ref[...] > 0.0, 0.0, -1e9)            # (1, S) f32

    # --- fused QKV projection: one bf16 MXU matmul, unpadded segments.
    qkv = jnp.dot(x.astype(jnp.bfloat16), wqkv_ref[...],
                  preferred_element_type=jnp.float32) + bqkv_ref[...]  # (S, 3H)
    q = qkv[:, 0 * H:1 * H]
    k = qkv[:, 1 * H:2 * H]
    v = qkv[:, 2 * H:3 * H]

    # --- multi-head attention, heads kept on the lane axis (no transposes).
    # Masking q / v per head makes the full-H contraction equal the per-head one.
    # TODO(synk): at real sizes (12 heads, head_dim 64) use a head grid axis /
    # flash-style kernel and lax.fori_loop instead of this unrolled masked loop.
    lane = lax.broadcasted_iota(jnp.int32, (1, H), 1)
    k_bf = k.astype(jnp.bfloat16)
    scale = 1.0 / (HEAD_DIM ** 0.5)
    ctx = jnp.zeros((S, H), jnp.float32)
    for h in range(NUM_HEADS):
        hm = ((lane >= h * HEAD_DIM) &
              (lane < (h + 1) * HEAD_DIM)).astype(jnp.float32)       # (1, H)
        s = lax.dot_general((q * hm).astype(jnp.bfloat16), k_bf, _NT,
                            preferred_element_type=jnp.float32)      # (S, S)
        s = s * scale + key_bias
        s = s - jnp.max(s, axis=-1, keepdims=True)
        p = jnp.exp(s)
        p = p * pl.reciprocal(jnp.sum(p, axis=-1, keepdims=True), approx=True)
        ctx = ctx + jnp.dot(p.astype(jnp.bfloat16),
                            (v * hm).astype(jnp.bfloat16),
                            preferred_element_type=jnp.float32)      # (S, H)

    # --- attention output projection + residual + LayerNorm1 (fused)
    attn_out = jnp.dot(ctx.astype(jnp.bfloat16), wo_ref[...],
                       preferred_element_type=jnp.float32) + bo_ref[...]
    x1 = _layernorm(x + attn_out, ln1g_ref[...], ln1b_ref[...])

    # --- fused FFN: matmul + GELU + matmul + residual + LayerNorm2
    h1 = jnp.dot(x1.astype(jnp.bfloat16), w1_ref[...],
                 preferred_element_type=jnp.float32) + b1_ref[...]
    # TODO(synk): HF roberta uses exact (erf) GELU; tanh approximation used here.
    h1 = jax.nn.gelu(h1, approximate=True)
    h2 = jnp.dot(h1.astype(jnp.bfloat16), w2_ref[...],
                 preferred_element_type=jnp.float32) + b2_ref[...]
    x_new = _layernorm(x1 + h2, ln2g_ref[...], ln2b_ref[...])
    x_scr[...] = x_new

    # --- last layer step: fused classifier + weighted cross-entropy pieces.
    @pl.when(l == last_l)
    def _():
        # Compute all S rows (full sublane tile) and take the CLS row of the
        # result; at toy size this is cheaper than an M=1 matmul relayout.
        logits_all = jnp.dot(x_new, clsw_ref[...],
                             preferred_element_type=jnp.float32) + clsb_ref[...]
        logits_row = logits_all[0:1, :]                              # (1, NLAB_PAD)
        logits_ref[...] = logits_row

        lab = labels_ref[b]                                          # SMEM scalar
        w_i = cw_ref[lab]                                            # SMEM gather
        lane_p = lax.broadcasted_iota(jnp.int32, (1, NLAB_PAD), 1)
        m = jnp.max(logits_row, axis=-1, keepdims=True)
        z = logits_row - m
        lse = jnp.log(jnp.sum(jnp.exp(z), axis=-1, keepdims=True))
        picked = jnp.sum(jnp.where(lane_p == lab, z, 0.0),
                         axis=-1, keepdims=True)
        # NOTE: sum(den)==0 (all sampled classes with zero weight) would
        # reproduce PyTorch's 0/0 NaN; not possible with the weights used here.
        num_ref[...] = w_i * (lse - picked)
        den_ref[...] = w_i * jnp.ones((1, 1), jnp.float32)


def encoder_classifier_forward(params, x_emb, mask, labels, class_weights):
    def rep(shape):                       # same block every grid step
        return pl.BlockSpec(shape, lambda b, l: (0, 0))

    def per_batch(shape):                 # blocked by batch, squeezed lead dim
        return pl.BlockSpec((None,) + shape, lambda b, l: (b, 0, 0))

    def per_layer(shape):                 # stacked weights, indexed by layer
        return pl.BlockSpec((None,) + shape, lambda b, l: (l, 0, 0))

    return pl.pallas_call(
        encoder_kernel,
        out_shape=(
            jax.ShapeDtypeStruct((B, 1, NLAB_PAD), jnp.float32),     # padded logits
            jax.ShapeDtypeStruct((B, 1, 1), jnp.float32),            # w_i * nll_i
            jax.ShapeDtypeStruct((B, 1, 1), jnp.float32),            # w_i
        ),
        grid=(B, LAYERS),
        in_specs=[
            per_batch((S, H)),                                 # raw embedding sum
            rep((1, H)), rep((1, H)),                          # embedding LN g/b
            per_batch((1, S)),                                 # attention-mask row
            per_layer((H, 3 * H)), per_layer((1, 3 * H)),      # wqkv, bqkv
            per_layer((H, H)), per_layer((1, H)),              # wo, bo
            per_layer((1, H)), per_layer((1, H)),              # ln1 g/b
            per_layer((H, FFN)), per_layer((1, FFN)),          # w1, b1
            per_layer((FFN, H)), per_layer((1, H)),            # w2, b2
            per_layer((1, H)), per_layer((1, H)),              # ln2 g/b
            rep((H, NLAB_PAD)), rep((1, NLAB_PAD)),            # classifier w/b
            pl.BlockSpec(memory_space=pltpu.MemorySpace.SMEM),  # labels
            pl.BlockSpec(memory_space=pltpu.MemorySpace.SMEM),  # class weights
        ],
        out_specs=(
            pl.BlockSpec((None, 1, NLAB_PAD), lambda b, l: (b, 0, 0)),
            pl.BlockSpec((None, 1, 1), lambda b, l: (b, 0, 0)),
            pl.BlockSpec((None, 1, 1), lambda b, l: (b, 0, 0)),
        ),
        scratch_shapes=[pltpu.VMEM((S, H), jnp.float32)],       # resident hidden carry
        compiler_params=pltpu.CompilerParams(
            # batch axis parallel (v7x 2 TCs), layer axis sequential carry.
            # TODO(synk): at real roberta-base sizes also set vmem_limit_bytes
            # and tile the FFN inner dim for v7x's 64 MiB VMEM.
            dimension_semantics=("parallel", "arbitrary")),
    )(x_emb, params["emb_ln_g"], params["emb_ln_b"], mask,
      params["wqkv"], params["bqkv"], params["wo"], params["bo"],
      params["ln1_g"], params["ln1_b"], params["w1"], params["b1"],
      params["w2"], params["b2"], params["ln2_g"], params["ln2_b"],
      params["cls_w"], params["cls_b"],
      labels.astype(jnp.int32), class_weights.astype(jnp.float32))


# ------------------------------ parameters -------------------------------------
def init_params(key):
    ks = iter(jax.random.split(key, 16))

    def nrm(shape, scale=0.02):
        return (scale * jax.random.normal(next(ks), shape)).astype(jnp.float32)

    wq, wk, wv = nrm((LAYERS, H, H)), nrm((LAYERS, H, H)), nrm((LAYERS, H, H))
    wqkv = jnp.concatenate([wq, wk, wv], axis=-1)            # (LAYERS, H, 3H), unpadded
    wo = nrm((LAYERS, H, H))                                 # unpadded (no zero rows)

    cls_w = nrm((H, NUM_LABELS))
    cls_w_pad = jnp.zeros((H, NLAB_PAD), jnp.float32).at[:, :NUM_LABELS].set(cls_w)
    # padded logit columns get a -1e9 bias so they never affect max / logsumexp
    cls_b_pad = jnp.full((1, NLAB_PAD), -1e9, jnp.float32).at[:, :NUM_LABELS].set(0.0)

    return {
        "word_emb": nrm((VOCAB, H)),
        "pos_emb": nrm((S, H)),
        "type_emb": nrm((1, H)),
        "emb_ln_g": jnp.ones((1, H), jnp.float32),
        "emb_ln_b": jnp.zeros((1, H), jnp.float32),
        # encoder weights stacked over layers; MXU operands stored in bf16
        "wqkv": wqkv.astype(jnp.bfloat16),
        "bqkv": jnp.zeros((LAYERS, 1, 3 * H), jnp.float32),
        "wo": wo.astype(jnp.bfloat16),
        "bo": jnp.zeros((LAYERS, 1, H), jnp.float32),
        "ln1_g": jnp.ones((LAYERS, 1, H), jnp.float32),
        "ln1_b": jnp.zeros((LAYERS, 1, H), jnp.float32),
        "w1": nrm((LAYERS, H, FFN)).astype(jnp.bfloat16),
        "b1": jnp.zeros((LAYERS, 1, FFN), jnp.float32),
        "w2": nrm((LAYERS, FFN, H)).astype(jnp.bfloat16),
        "b2": jnp.zeros((LAYERS, 1, H), jnp.float32),
        "ln2_g": jnp.ones((LAYERS, 1, H), jnp.float32),
        "ln2_b": jnp.zeros((LAYERS, 1, H), jnp.float32),
        "cls_w": cls_w_pad,
        "cls_b": cls_b_pad,
    }


# ------------------------------ forward pass ------------------------------------
def bert_classifier_forward(params, input_ids, attention_mask, labels, loss_weights):
    # Embeddings (gather + add are XLA glue; the embedding LayerNorm is fused
    # into the first encoder grid step).  Dropout = eval mode.
    # TODO(synk): RoBERTa offsets position ids by padding_idx+1; 0..S-1 used here.
    tok = jnp.take(params["word_emb"], input_ids, axis=0)            # (B, S, H)
    x_emb = (tok + params["pos_emb"][None] + params["type_emb"][None]).astype(jnp.float32)

    mask = attention_mask.astype(jnp.float32).reshape(B, 1, S)       # key-padding mask

    logits_pad, num, den = encoder_classifier_forward(
        params, x_emb, mask, labels, loss_weights)

    logits = logits_pad.reshape(B, NLAB_PAD)[:, :NUM_LABELS]
    loss = jnp.sum(num) / jnp.sum(den)                               # weighted CE
    return loss, logits


# ------------------------------ main --------------------------------------------
if __name__ == "__main__":
    key = jax.random.PRNGKey(0)
    kp, ki, kl = jax.random.split(key, 3)

    params = init_params(kp)
    input_ids = jax.random.randint(ki, (B, S), 0, VOCAB, dtype=jnp.int32)
    attention_mask = jnp.ones((B, S), jnp.int32).at[1, S - 2:].set(0)  # pad tail of seq 1
    labels = jax.random.randint(kl, (B,), 0, NUM_LABELS, dtype=jnp.int32)
    loss_weights = jnp.array([1.0, 2.0, 0.5], jnp.float32)

    fwd = jax.jit(bert_classifier_forward)
    loss, logits = fwd(params, input_ids, attention_mask, labels, loss_weights)
    jax.block_until_ready((loss, logits))
    assert logits.shape == (B, NUM_LABELS) and loss.shape == ()
    assert bool(jnp.isfinite(loss))
    print("KERNEL_OK")
</pallas_src>

<mosaic_0001>
module attributes {stable_mosaic.version = 11 : i64} {
  func.func @encoder_kernel(%arg0: i32, %arg1: i32, %arg2: memref<1x8x64xf32, #tpu.memory_space<vmem>>, %arg3: memref<1x64xf32, #tpu.memory_space<vmem>>, %arg4: memref<1x64xf32, #tpu.memory_space<vmem>>, %arg5: memref<1x1x8xf32, #tpu.memory_space<vmem>>, %arg6: memref<1x64x192xbf16, #tpu.memory_space<vmem>>, %arg7: memref<1x1x192xf32, #tpu.memory_space<vmem>>, %arg8: memref<1x64x64xbf16, #tpu.memory_space<vmem>>, %arg9: memref<1x1x64xf32, #tpu.memory_space<vmem>>, %arg10: memref<1x1x64xf32, #tpu.memory_space<vmem>>, %arg11: memref<1x1x64xf32, #tpu.memory_space<vmem>>, %arg12: memref<1x64x128xbf16, #tpu.memory_space<vmem>>, %arg13: memref<1x1x128xf32, #tpu.memory_space<vmem>>, %arg14: memref<1x128x64xbf16, #tpu.memory_space<vmem>>, %arg15: memref<1x1x64xf32, #tpu.memory_space<vmem>>, %arg16: memref<1x1x64xf32, #tpu.memory_space<vmem>>, %arg17: memref<1x1x64xf32, #tpu.memory_space<vmem>>, %arg18: memref<64x128xf32, #tpu.memory_space<vmem>>, %arg19: memref<1x128xf32, #tpu.memory_space<vmem>>, %arg20: memref<2xi32, #tpu.memory_space<smem>>, %arg21: memref<3xf32, #tpu.memory_space<smem>>, %arg22: memref<1x1x128xf32, #tpu.memory_space<vmem>>, %arg23: memref<1x1x1xf32, #tpu.memory_space<vmem>>, %arg24: memref<1x1x1xf32, #tpu.memory_space<vmem>>, %arg25: memref<8x64xf32, #tpu.memory_space<vmem>>) attributes {dimension_semantics = [#tpu.dimension_semantics<parallel>, #tpu.dimension_semantics<arbitrary>], iteration_bounds = array<i64: 2, 2>, scalar_prefetch = 0 : i64, scratch_operands = 1 : i64, tpu.core_type = #tpu.core_type<tc>, window_params = [{transform_indices = @transform_0, window_bounds = array<i64: 1, 8, 64>}, {pipeline_mode = #tpu.pipeline_mode<synchronous>, transform_indices = @transform_1, window_bounds = array<i64: 1, 64>}, {pipeline_mode = #tpu.pipeline_mode<synchronous>, transform_indices = @transform_2, window_bounds = array<i64: 1, 64>}, {transform_indices = @transform_3, window_bounds = array<i64: 1, 1, 8>}, {transform_indices = @transform_4, window_bounds = array<i64: 1, 64, 192>}, {transform_indices = @transform_5, window_bounds = array<i64: 1, 1, 192>}, {transform_indices = @transform_6, window_bounds = array<i64: 1, 64, 64>}, {transform_indices = @transform_7, window_bounds = array<i64: 1, 1, 64>}, {transform_indices = @transform_8, window_bounds = array<i64: 1, 1, 64>}, {transform_indices = @transform_9, window_bounds = array<i64: 1, 1, 64>}, {transform_indices = @transform_10, window_bounds = array<i64: 1, 64, 128>}, {transform_indices = @transform_11, window_bounds = array<i64: 1, 1, 128>}, {transform_indices = @transform_12, window_bounds = array<i64: 1, 128, 64>}, {transform_indices = @transform_13, window_bounds = array<i64: 1, 1, 64>}, {transform_indices = @transform_14, window_bounds = array<i64: 1, 1, 64>}, {transform_indices = @transform_15, window_bounds = array<i64: 1, 1, 64>}, {pipeline_mode = #tpu.pipeline_mode<synchronous>, transform_indices = @transform_16, window_bounds = array<i64: 64, 128>}, {pipeline_mode = #tpu.pipeline_mode<synchronous>, transform_indices = @transform_17, window_bounds = array<i64: 1, 128>}, {transform_indices = @transform_18, window_bounds = array<i64: 2>}, {transform_indices = @transform_19, window_bounds = array<i64: 3>}, {transform_indices = @transform_20, window_bounds = array<i64: 1, 1, 128>}, {transform_indices = @transform_21, window_bounds = array<i64: 1, 1, 1>}, {transform_indices = @transform_22, window_bounds = array<i64: 1, 1, 1>}]} {
    %c0_i32 = arith.constant 0 : i32
    %0 = arith.cmpi eq, %arg1, %c0_i32 : i32
    %1 = arith.extui %0 : i1 to i32
    %c0_i32_0 = arith.constant 0 : i32
    %2 = arith.cmpi ne, %1, %c0_i32_0 : i32
    scf.if %2 {
      %c0_89 = arith.constant 0 : index
      %c0_90 = arith.constant 0 : index
      %c0_91 = arith.constant 0 : index
      %244 = vector.load %arg2[%c0_89, %c0_90, %c0_91] : memref<1x8x64xf32, #tpu.memory_space<vmem>>, vector<1x8x64xf32>
      %245 = vector.shape_cast %244 : vector<1x8x64xf32> to vector<8x64xf32>
      %c0_92 = arith.constant 0 : index
      %c0_93 = arith.constant 0 : index
      %246 = vector.load %arg3[%c0_92, %c0_93] : memref<1x64xf32, #tpu.memory_space<vmem>>, vector<1x64xf32>
      %c0_94 = arith.constant 0 : index
      %c0_95 = arith.constant 0 : index
      %247 = vector.load %arg4[%c0_94, %c0_95] : memref<1x64xf32, #tpu.memory_space<vmem>>, vector<1x64xf32>
      %cst_96 = arith.constant dense<0.000000e+00> : vector<8xf32>
      %248 = vector.multi_reduction <add>, %245, %cst_96 [1] : vector<8x64xf32> to vector<8xf32>
      %249 = vector.shape_cast %248 : vector<8xf32> to vector<8x1xf32>
      %cst_97 = arith.constant 6.400000e+01 : f32
      %250 = vector.broadcast %cst_97 : f32 to vector<8x1xf32>
      %251 = arith.divf %249, %250 : vector<8x1xf32>
      %252 = vector.broadcast %251 : vector<8x1xf32> to vector<8x64xf32>
      %253 = arith.subf %245, %252 : vector<8x64xf32>
      %254 = arith.mulf %253, %253 : vector<8x64xf32>
      %cst_98 = arith.constant dense<0.000000e+00> : vector<8xf32>
      %255 = vector.multi_reduction <add>, %254, %cst_98 [1] : vector<8x64xf32> to vector<8xf32>
      %256 = vector.shape_cast %255 : vector<8xf32> to vector<8x1xf32>
      %cst_99 = arith.constant 6.400000e+01 : f32
      %257 = vector.broadcast %cst_99 : f32 to vector<8x1xf32>
      %258 = arith.divf %256, %257 : vector<8x1xf32>
      %259 = vector.broadcast %251 : vector<8x1xf32> to vector<8x64xf32>
      %260 = arith.subf %245, %259 : vector<8x64xf32>
      %cst_100 = arith.constant 9.99999974E-6 : f32
      %261 = vector.broadcast %cst_100 : f32 to vector<8x1xf32>
      %262 = arith.addf %258, %261 : vector<8x1xf32>
      %263 = math.rsqrt %262 : vector<8x1xf32>
      %264 = vector.broadcast %263 : vector<8x1xf32> to vector<8x64xf32>
      %265 = arith.mulf %260, %264 : vector<8x64xf32>
      %266 = vector.broadcast %246 : vector<1x64xf32> to vector<8x64xf32>
      %267 = arith.mulf %265, %266 : vector<8x64xf32>
      %268 = vector.broadcast %247 : vector<1x64xf32> to vector<8x64xf32>
      %269 = arith.addf %267, %268 : vector<8x64xf32>
      %c0_101 = arith.constant 0 : index
      %c0_102 = arith.constant 0 : index
      %270 = vector.load %arg25[%c0_101, %c0_102] : memref<8x64xf32, #tpu.memory_space<vmem>>, vector<8x64xf32>
      tpu.vector_store %arg25[%c0_101, %c0_102], %269 {strides = array<i32>} : memref<8x64xf32, #tpu.memory_space<vmem>>, vector<8x64xf32>,
    } else {
    }
    %c0 = arith.constant 0 : index
    %c0_1 = arith.constant 0 : index
    %3 = vector.load %arg25[%c0, %c0_1] : memref<8x64xf32, #tpu.memory_space<vmem>>, vector<8x64xf32>
    %c0_2 = arith.constant 0 : index
    %c0_3 = arith.constant 0 : index
    %c0_4 = arith.constant 0 : index
    %4 = vector.load %arg5[%c0_2, %c0_3, %c0_4] : memref<1x1x8xf32, #tpu.memory_space<vmem>>, vector<1x1x8xf32>
    %5 = vector.shape_cast %4 : vector<1x1x8xf32> to vector<1x8xf32>
    %cst = arith.constant 0.000000e+00 : f32
    %6 = vector.broadcast %cst : f32 to vector<1x8xf32>
    %7 = arith.cmpf ogt, %5, %6 : vector<1x8xf32>
    %cst_5 = arith.constant 0.000000e+00 : f32
    %cst_6 = arith.constant -1.000000e+09 : f32
    %8 = vector.broadcast %cst_5 : f32 to vector<1x8xf32>
    %9 = vector.broadcast %cst_6 : f32 to vector<1x8xf32>
    %10 = arith.select %7, %8, %9 : vector<1x8xi1>, vector<1x8xf32>
    %11 = arith.truncf %3 : vector<8x64xf32> to vector<8x64xbf16>
    %c0_7 = arith.constant 0 : index
    %c0_8 = arith.constant 0 : index
    %c0_9 = arith.constant 0 : index
    %12 = vector.load %arg6[%c0_7, %c0_8, %c0_9] : memref<1x64x192xbf16, #tpu.memory_space<vmem>>, vector<1x64x192xbf16>
    %13 = vector.shape_cast %12 : vector<1x64x192xbf16> to vector<64x192xbf16>
    %cst_10 = arith.constant dense<0.000000e+00> : vector<8x192xf32>
    %14 = tpu.matmul %11, %13, %cst_10 {dimension_numbers = #tpu.dot_dimension_numbers<[1], [0], [0], [1], [0, 0, 1, 1], [], []>} : vector<8x64xbf16>, vector<64x192xbf16>, vector<8x192xf32> -> vector<8x192xf32>
    %c0_11 = arith.constant 0 : index
    %c0_12 = arith.constant 0 : index
    %c0_13 = arith.constant 0 : index
    %15 = vector.load %arg7[%c0_11, %c0_12, %c0_13] : memref<1x1x192xf32, #tpu.memory_space<vmem>>, vector<1x1x192xf32>
    %16 = vector.shape_cast %15 : vector<1x1x192xf32> to vector<1x192xf32>
    %17 = vector.broadcast %16 : vector<1x192xf32> to vector<8x192xf32>
    %18 = arith.addf %14, %17 : vector<8x192xf32>
    %19 = vector.extract_strided_slice %18 {offsets = [0, 0], sizes = [8, 64], strides = [1, 1]} : vector<8x192xf32> to vector<8x64xf32>
    %20 = vector.extract_strided_slice %18 {offsets = [0, 64], sizes = [8, 64], strides = [1, 1]} : vector<8x192xf32> to vector<8x64xf32>
    %21 = vector.extract_strided_slice %18 {offsets = [0, 128], sizes = [8, 64], strides = [1, 1]} : vector<8x192xf32> to vector<8x64xf32>
    %22 = tpu.iota {dimensions = array<i32: 1>} : vector<1x64xi32>
    %23 = arith.truncf %20 : vector<8x64xf32> to vector<8x64xbf16>
    %cst_14 = arith.constant 0.000000e+00 : f32
    %24 = vector.broadcast %cst_14 : f32 to vector<8x64xf32>
    %c0_i32_15 = arith.constant 0 : i32
    %25 = vector.broadcast %c0_i32_15 : i32 to vector<1x64xi32>
    %26 = arith.cmpi sge, %22, %25 : vector<1x64xi32>
    %c16_i32 = arith.constant 16 : i32
    %27 = vector.broadcast %c16_i32 : i32 to vector<1x64xi32>
    %28 = arith.cmpi slt, %22, %27 : vector<1x64xi32>
    %29 = arith.andi %26, %28 : vector<1x64xi1>
    %30 = arith.extui %29 : vector<1x64xi1> to vector<1x64xi32>
    %31 = arith.sitofp %30 : vector<1x64xi32> to vector<1x64xf32>
    %32 = vector.broadcast %31 : vector<1x64xf32> to vector<8x64xf32>
    %33 = arith.mulf %19, %32 : vector<8x64xf32>
    %34 = arith.truncf %33 : vector<8x64xf32> to vector<8x64xbf16>
    %cst_16 = arith.constant dense<0.000000e+00> : vector<8x8xf32>
    %35 = tpu.matmul %34, %23, %cst_16 {dimension_numbers = #tpu.dot_dimension_numbers<[1], [1], [0], [0], [0, 0, 1, 0], [], []>} : vector<8x64xbf16>, vector<8x64xbf16>, vector<8x8xf32> -> vector<8x8xf32>
    %cst_17 = arith.constant 2.500000e-01 : f32
    %36 = vector.broadcast %cst_17 : f32 to vector<8x8xf32>
    %37 = arith.mulf %35, %36 : vector<8x8xf32>
    %38 = vector.broadcast %10 : vector<1x8xf32> to vector<8x8xf32>
    %39 = arith.addf %37, %38 : vector<8x8xf32>
    %cst_18 = arith.constant dense<0xFF800000> : vector<8xf32>
    %40 = vector.multi_reduction <maximumf>, %39, %cst_18 [1] : vector<8x8xf32> to vector<8xf32>
    %41 = vector.shape_cast %40 : vector<8xf32> to vector<8x1xf32>
    %42 = vector.broadcast %41 : vector<8x1xf32> to vector<8x8xf32>
    %43 = arith.subf %39, %42 : vector<8x8xf32>
    %44 = math.exp %43 : vector<8x8xf32>
    %cst_19 = arith.constant dense<0.000000e+00> : vector<8xf32>
    %45 = vector.multi_reduction <add>, %44, %cst_19 [1] : vector<8x8xf32> to vector<8xf32>
    %46 = vector.shape_cast %45 : vector<8xf32> to vector<8x1xf32>
    %47 = tpu.reciprocal %46 {approx = true} : vector<8x1xf32> -> vector<8x1xf32>
    %48 = vector.broadcast %47 : vector<8x1xf32> to vector<8x8xf32>
    %49 = arith.mulf %44, %48 : vector<8x8xf32>
    %50 = arith.truncf %49 : vector<8x8xf32> to vector<8x8xbf16>
    %51 = vector.broadcast %31 : vector<1x64xf32> to vector<8x64xf32>
    %52 = arith.mulf %21, %51 : vector<8x64xf32>
    %53 = arith.truncf %52 : vector<8x64xf32> to vector<8x64xbf16>
    %cst_20 = arith.constant dense<0.000000e+00> : vector<8x64xf32>
    %54 = tpu.matmul %50, %53, %cst_20 {dimension_numbers = #tpu.dot_dimension_numbers<[1], [0], [0], [1], [0, 0, 1, 1], [], []>} : vector<8x8xbf16>, vector<8x64xbf16>, vector<8x64xf32> -> vector<8x64xf32>
    %55 = arith.addf %24, %54 : vector<8x64xf32>
    %c16_i32_21 = arith.constant 16 : i32
    %56 = vector.broadcast %c16_i32_21 : i32 to vector<1x64xi32>
    %57 = arith.cmpi sge, %22, %56 : vector<1x64xi32>
    %c32_i32 = arith.constant 32 : i32
    %58 = vector.broadcast %c32_i32 : i32 to vector<1x64xi32>
    %59 = arith.cmpi slt, %22, %58 : vector<1x64xi32>
    %60 = arith.andi %57, %59 : vector<1x64xi1>
    %61 = arith.extui %60 : vector<1x64xi1> to vector<1x64xi32>
    %62 = arith.sitofp %61 : vector<1x64xi32> to vector<1x64xf32>
    %63 = vector.broadcast %62 : vector<1x64xf32> to vector<8x64xf32>
    %64 = arith.mulf %19, %63 : vector<8x64xf32>
    %65 = arith.truncf %64 : vector<8x64xf32> to vector<8x64xbf16>
    %cst_22 = arith.constant dense<0.000000e+00> : vector<8x8xf32>
    %66 = tpu.matmul %65, %23, %cst_22 {dimension_numbers = #tpu.dot_dimension_numbers<[1], [1], [0], [0], [0, 0, 1, 0], [], []>} : vector<8x64xbf16>, vector<8x64xbf16>, vector<8x8xf32> -> vector<8x8xf32>
    %cst_23 = arith.constant 2.500000e-01 : f32
    %67 = vector.broadcast %cst_23 : f32 to vector<8x8xf32>
    %68 = arith.mulf %66, %67 : vector<8x8xf32>
    %69 = vector.broadcast %10 : vector<1x8xf32> to vector<8x8xf32>
    %70 = arith.addf %68, %69 : vector<8x8xf32>
    %cst_24 = arith.constant dense<0xFF800000> : vector<8xf32>
    %71 = vector.multi_reduction <maximumf>, %70, %cst_24 [1] : vector<8x8xf32> to vector<8xf32>
    %72 = vector.shape_cast %71 : vector<8xf32> to vector<8x1xf32>
    %73 = vector.broadcast %72 : vector<8x1xf32> to vector<8x8xf32>
    %74 = arith.subf %70, %73 : vector<8x8xf32>
    %75 = math.exp %74 : vector<8x8xf32>
    %cst_25 = arith.constant dense<0.000000e+00> : vector<8xf32>
    %76 = vector.multi_reduction <add>, %75, %cst_25 [1] : vector<8x8xf32> to vector<8xf32>
    %77 = vector.shape_cast %76 : vector<8xf32> to vector<8x1xf32>
    %78 = tpu.reciprocal %77 {approx = true} : vector<8x1xf32> -> vector<8x1xf32>
    %79 = vector.broadcast %78 : vector<8x1xf32> to vector<8x8xf32>
    %80 = arith.mulf %75, %79 : vector<8x8xf32>
    %81 = arith.truncf %80 : vector<8x8xf32> to vector<8x8xbf16>
    %82 = vector.broadcast %62 : vector<1x64xf32> to vector<8x64xf32>
    %83 = arith.mulf %21, %82 : vector<8x64xf32>
    %84 = arith.truncf %83 : vector<8x64xf32> to vector<8x64xbf16>
    %cst_26 = arith.constant dense<0.000000e+00> : vector<8x64xf32>
    %85 = tpu.matmul %81, %84, %cst_26 {dimension_numbers = #tpu.dot_dimension_numbers<[1], [0], [0], [1], [0, 0, 1, 1], [], []>} : vector<8x8xbf16>, vector<8x64xbf16>, vector<8x64xf32> -> vector<8x64xf32>
    %86 = arith.addf %55, %85 : vector<8x64xf32>
    %c32_i32_27 = arith.constant 32 : i32
    %87 = vector.broadcast %c32_i32_27 : i32 to vector<1x64xi32>
    %88 = arith.cmpi sge, %22, %87 : vector<1x64xi32>
    %c48_i32 = arith.constant 48 : i32
    %89 = vector.broadcast %c48_i32 : i32 to vector<1x64xi32>
    %90 = arith.cmpi slt, %22, %89 : vector<1x64xi32>
    %91 = arith.andi %88, %90 : vector<1x64xi1>
    %92 = arith.extui %91 : vector<1x64xi1> to vector<1x64xi32>
    %93 = arith.sitofp %92 : vector<1x64xi32> to vector<1x64xf32>
    %94 = vector.broadcast %93 : vector<1x64xf32> to vector<8x64xf32>
    %95 = arith.mulf %19, %94 : vector<8x64xf32>
    %96 = arith.truncf %95 : vector<8x64xf32> to vector<8x64xbf16>
    %cst_28 = arith.constant dense<0.000000e+00> : vector<8x8xf32>
    %97 = tpu.matmul %96, %23, %cst_28 {dimension_numbers = #tpu.dot_dimension_numbers<[1], [1], [0], [0], [0, 0, 1, 0], [], []>} : vector<8x64xbf16>, vector<8x64xbf16>, vector<8x8xf32> -> vector<8x8xf32>
    %cst_29 = arith.constant 2.500000e-01 : f32
    %98 = vector.broadcast %cst_29 : f32 to vector<8x8xf32>
    %99 = arith.mulf %97, %98 : vector<8x8xf32>
    %100 = vector.broadcast %10 : vector<1x8xf32> to vector<8x8xf32>
    %101 = arith.addf %99, %100 : vector<8x8xf32>
    %cst_30 = arith.constant dense<0xFF800000> : vector<8xf32>
    %102 = vector.multi_reduction <maximumf>, %101, %cst_30 [1] : vector<8x8xf32> to vector<8xf32>
    %103 = vector.shape_cast %102 : vector<8xf32> to vector<8x1xf32>
    %104 = vector.broadcast %103 : vector<8x1xf32> to vector<8x8xf32>
    %105 = arith.subf %101, %104 : vector<8x8xf32>
    %106 = math.exp %105 : vector<8x8xf32>
    %cst_31 = arith.constant dense<0.000000e+00> : vector<8xf32>
    %107 = vector.multi_reduction <add>, %106, %cst_31 [1] : vector<8x8xf32> to vector<8xf32>
    %108 = vector.shape_cast %107 : vector<8xf32> to vector<8x1xf32>
    %109 = tpu.reciprocal %108 {approx = true} : vector<8x1xf32> -> vector<8x1xf32>
    %110 = vector.broadcast %109 : vector<8x1xf32> to vector<8x8xf32>
    %111 = arith.mulf %106, %110 : vector<8x8xf32>
    %112 = arith.truncf %111 : vector<8x8xf32> to vector<8x8xbf16>
    %113 = vector.broadcast %93 : vector<1x64xf32> to vector<8x64xf32>
    %114 = arith.mulf %21, %113 : vector<8x64xf32>
    %115 = arith.truncf %114 : vector<8x64xf32> to vector<8x64xbf16>
    %cst_32 = arith.constant dense<0.000000e+00> : vector<8x64xf32>
    %116 = tpu.matmul %112, %115, %cst_32 {dimension_numbers = #tpu.dot_dimension_numbers<[1], [0], [0], [1], [0, 0, 1, 1], [], []>} : vector<8x8xbf16>, vector<8x64xbf16>, vector<8x64xf32> -> vector<8x64xf32>
    %117 = arith.addf %86, %116 : vector<8x64xf32>
    %c48_i32_33 = arith.constant 48 : i32
    %118 = vector.broadcast %c48_i32_33 : i32 to vector<1x64xi32>
    %119 = arith.cmpi sge, %22, %118 : vector<1x64xi32>
    %c64_i32 = arith.constant 64 : i32
    %120 = vector.broadcast %c64_i32 : i32 to vector<1x64xi32>
    %121 = arith.cmpi slt, %22, %120 : vector<1x64xi32>
    %122 = arith.andi %119, %121 : vector<1x64xi1>
    %123 = arith.extui %122 : vector<1x64xi1> to vector<1x64xi32>
    %124 = arith.sitofp %123 : vector<1x64xi32> to vector<1x64xf32>
    %125 = vector.broadcast %124 : vector<1x64xf32> to vector<8x64xf32>
    %126 = arith.mulf %19, %125 : vector<8x64xf32>
    %127 = arith.truncf %126 : vector<8x64xf32> to vector<8x64xbf16>
    %cst_34 = arith.constant dense<0.000000e+00> : vector<8x8xf32>
    %128 = tpu.matmul %127, %23, %cst_34 {dimension_numbers = #tpu.dot_dimension_numbers<[1], [1], [0], [0], [0, 0, 1, 0], [], []>} : vector<8x64xbf16>, vector<8x64xbf16>, vector<8x8xf32> -> vector<8x8xf32>
    %cst_35 = arith.constant 2.500000e-01 : f32
    %129 = vector.broadcast %cst_35 : f32 to vector<8x8xf32>
    %130 = arith.mulf %128, %129 : vector<8x8xf32>
    %131 = vector.broadcast %10 : vector<1x8xf32> to vector<8x8xf32>
    %132 = arith.addf %130, %131 : vector<8x8xf32>
    %cst_36 = arith.constant dense<0xFF800000> : vector<8xf32>
    %133 = vector.multi_reduction <maximumf>, %132, %cst_36 [1] : vector<8x8xf32> to vector<8xf32>
    %134 = vector.shape_cast %133 : vector<8xf32> to vector<8x1xf32>
    %135 = vector.broadcast %134 : vector<8x1xf32> to vector<8x8xf32>
    %136 = arith.subf %132, %135 : vector<8x8xf32>
    %137 = math.exp %136 : vector<8x8xf32>
    %cst_37 = arith.constant dense<0.000000e+00> : vector<8xf32>
    %138 = vector.multi_reduction <add>, %137, %cst_37 [1] : vector<8x8xf32> to vector<8xf32>
    %139 = vector.shape_cast %138 : vector<8xf32> to vector<8x1xf32>
    %140 = tpu.reciprocal %139 {approx = true} : vector<8x1xf32> -> vector<8x1xf32>
    %141 = vector.broadcast %140 : vector<8x1xf32> to vector<8x8xf32>
    %142 = arith.mulf %137, %141 : vector<8x8xf32>
    %143 = arith.truncf %142 : vector<8x8xf32> to vector<8x8xbf16>
    %144 = vector.broadcast %124 : vector<1x64xf32> to vector<8x64xf32>
    %145 = arith.mulf %21, %144 : vector<8x64xf32>
    %146 = arith.truncf %145 : vector<8x64xf32> to vector<8x64xbf16>
    %cst_38 = arith.constant dense<0.000000e+00> : vector<8x64xf32>
    %147 = tpu.matmul %143, %146, %cst_38 {dimension_numbers = #tpu.dot_dimension_numbers<[1], [0], [0], [1], [0, 0, 1, 1], [], []>} : vector<8x8xbf16>, vector<8x64xbf16>, vector<8x64xf32> -> vector<8x64xf32>
    %148 = arith.addf %117, %147 : vector<8x64xf32>
    %149 = arith.truncf %148 : vector<8x64xf32> to vector<8x64xbf16>
    %c0_39 = arith.constant 0 : index
    %c0_40 = arith.constant 0 : index
    %c0_41 = arith.constant 0 : index
    %150 = vector.load %arg8[%c0_39, %c0_40, %c0_41] : memref<1x64x64xbf16, #tpu.memory_space<vmem>>, vector<1x64x64xbf16>
    %151 = vector.shape_cast %150 : vector<1x64x64xbf16> to vector<64x64xbf16>
    %cst_42 = arith.constant dense<0.000000e+00> : vector<8x64xf32>
    %152 = tpu.matmul %149, %151, %cst_42 {dimension_numbers = #tpu.dot_dimension_numbers<[1], [0], [0], [1], [0, 0, 1, 1], [], []>} : vector<8x64xbf16>, vector<64x64xbf16>, vector<8x64xf32> -> vector<8x64xf32>
    %c0_43 = arith.constant 0 : index
    %c0_44 = arith.constant 0 : index
    %c0_45 = arith.constant 0 : index
    %153 = vector.load %arg9[%c0_43, %c0_44, %c0_45] : memref<1x1x64xf32, #tpu.memory_space<vmem>>, vector<1x1x64xf32>
    %154 = vector.shape_cast %153 : vector<1x1x64xf32> to vector<1x64xf32>
    %155 = vector.broadcast %154 : vector<1x64xf32> to vector<8x64xf32>
    %156 = arith.addf %152, %155 : vector<8x64xf32>
    %157 = arith.addf %3, %156 : vector<8x64xf32>
    %c0_46 = arith.constant 0 : index
    %c0_47 = arith.constant 0 : index
    %c0_48 = arith.constant 0 : index
    %158 = vector.load %arg10[%c0_46, %c0_47, %c0_48] : memref<1x1x64xf32, #tpu.memory_space<vmem>>, vector<1x1x64xf32>
    %159 = vector.shape_cast %158 : vector<1x1x64xf32> to vector<1x64xf32>
    %c0_49 = arith.constant 0 : index
    %c0_50 = arith.constant 0 : index
    %c0_51 = arith.constant 0 : index
    %160 = vector.load %arg11[%c0_49, %c0_50, %c0_51] : memref<1x1x64xf32, #tpu.memory_space<vmem>>, vector<1x1x64xf32>
    %161 = vector.shape_cast %160 : vector<1x1x64xf32> to vector<1x64xf32>
    %cst_52 = arith.constant dense<0.000000e+00> : vector<8xf32>
    %162 = vector.multi_reduction <add>, %157, %cst_52 [1] : vector<8x64xf32> to vector<8xf32>
    %163 = vector.shape_cast %162 : vector<8xf32> to vector<8x1xf32>
    %cst_53 = arith.constant 6.400000e+01 : f32
    %164 = vector.broadcast %cst_53 : f32 to vector<8x1xf32>
    %165 = arith.divf %163, %164 : vector<8x1xf32>
    %166 = vector.broadcast %165 : vector<8x1xf32> to vector<8x64xf32>
    %167 = arith.subf %157, %166 : vector<8x64xf32>
    %168 = arith.mulf %167, %167 : vector<8x64xf32>
    %cst_54 = arith.constant dense<0.000000e+00> : vector<8xf32>
    %169 = vector.multi_reduction <add>, %168, %cst_54 [1] : vector<8x64xf32> to vector<8xf32>
    %170 = vector.shape_cast %169 : vector<8xf32> to vector<8x1xf32>
    %cst_55 = arith.constant 6.400000e+01 : f32
    %171 = vector.broadcast %cst_55 : f32 to vector<8x1xf32>
    %172 = arith.divf %170, %171 : vector<8x1xf32>
    %173 = vector.broadcast %165 : vector<8x1xf32> to vector<8x64xf32>
    %174 = arith.subf %157, %173 : vector<8x64xf32>
    %cst_56 = arith.constant 9.99999974E-6 : f32
    %175 = vector.broadcast %cst_56 : f32 to vector<8x1xf32>
    %176 = arith.addf %172, %175 : vector<8x1xf32>
    %177 = math.rsqrt %176 : vector<8x1xf32>
    %178 = vector.broadcast %177 : vector<8x1xf32> to vector<8x64xf32>
    %179 = arith.mulf %174, %178 : vector<8x64xf32>
    %180 = vector.broadcast %159 : vector<1x64xf32> to vector<8x64xf32>
    %181 = arith.mulf %179, %180 : vector<8x64xf32>
    %182 = vector.broadcast %161 : vector<1x64xf32> to vector<8x64xf32>
    %183 = arith.addf %181, %182 : vector<8x64xf32>
    %184 = arith.truncf %183 : vector<8x64xf32> to vector<8x64xbf16>
    %c0_57 = arith.constant 0 : index
    %c0_58 = arith.constant 0 : index
    %c0_59 = arith.constant 0 : index
    %185 = vector.load %arg12[%c0_57, %c0_58, %c0_59] : memref<1x64x128xbf16, #tpu.memory_space<vmem>>, vector<1x64x128xbf16>
    %186 = vector.shape_cast %185 : vector<1x64x128xbf16> to vector<64x128xbf16>
    %cst_60 = arith.constant dense<0.000000e+00> : vector<8x128xf32>
    %187 = tpu.matmul %184, %186, %cst_60 {dimension_numbers = #tpu.dot_dimension_numbers<[1], [0], [0], [1], [0, 0, 1, 1], [], []>} : vector<8x64xbf16>, vector<64x128xbf16>, vector<8x128xf32> -> vector<8x128xf32>
    %c0_61 = arith.constant 0 : index
    %c0_62 = arith.constant 0 : index
    %c0_63 = arith.constant 0 : index
    %188 = vector.load %arg13[%c0_61, %c0_62, %c0_63] : memref<1x1x128xf32, #tpu.memory_space<vmem>>, vector<1x1x128xf32>
    %189 = vector.shape_cast %188 : vector<1x1x128xf32> to vector<1x128xf32>
    %190 = vector.broadcast %189 : vector<1x128xf32> to vector<8x128xf32>
    %191 = arith.addf %187, %190 : vector<8x128xf32>
    %192 = arith.mulf %191, %191 : vector<8x128xf32>
    %193 = arith.mulf %191, %192 : vector<8x128xf32>
    %cst_64 = arith.constant 4.471500e-02 : f32
    %194 = vector.broadcast %cst_64 : f32 to vector<8x128xf32>
    %195 = arith.mulf %194, %193 : vector<8x128xf32>
    %196 = arith.addf %191, %195 : vector<8x128xf32>
    %cst_65 = arith.constant 0.797884583 : f32
    %197 = vector.broadcast %cst_65 : f32 to vector<8x128xf32>
    %198 = arith.mulf %197, %196 : vector<8x128xf32>
    %199 = math.tanh %198 : vector<8x128xf32>
    %cst_66 = arith.constant 1.000000e+00 : f32
    %200 = vector.broadcast %cst_66 : f32 to vector<8x128xf32>
    %201 = arith.addf %200, %199 : vector<8x128xf32>
    %cst_67 = arith.constant 5.000000e-01 : f32
    %202 = vector.broadcast %cst_67 : f32 to vector<8x128xf32>
    %203 = arith.mulf %202, %201 : vector<8x128xf32>
    %204 = arith.mulf %191, %203 : vector<8x128xf32>
    %205 = arith.truncf %204 : vector<8x128xf32> to vector<8x128xbf16>
    %c0_68 = arith.constant 0 : index
    %c0_69 = arith.constant 0 : index
    %c0_70 = arith.constant 0 : index
    %206 = vector.load %arg14[%c0_68, %c0_69, %c0_70] : memref<1x128x64xbf16, #tpu.memory_space<vmem>>, vector<1x128x64xbf16>
    %207 = vector.shape_cast %206 : vector<1x128x64xbf16> to vector<128x64xbf16>
    %cst_71 = arith.constant dense<0.000000e+00> : vector<8x64xf32>
    %208 = tpu.matmul %205, %207, %cst_71 {dimension_numbers = #tpu.dot_dimension_numbers<[1], [0], [0], [1], [0, 0, 1, 1], [], []>} : vector<8x128xbf16>, vector<128x64xbf16>, vector<8x64xf32> -> vector<8x64xf32>
    %c0_72 = arith.constant 0 : index
    %c0_73 = arith.constant 0 : index
    %c0_74 = arith.constant 0 : index
    %209 = vector.load %arg15[%c0_72, %c0_73, %c0_74] : memref<1x1x64xf32, #tpu.memory_space<vmem>>, vector<1x1x64xf32>
    %210 = vector.shape_cast %209 : vector<1x1x64xf32> to vector<1x64xf32>
    %211 = vector.broadcast %210 : vector<1x64xf32> to vector<8x64xf32>
    %212 = arith.addf %208, %211 : vector<8x64xf32>
    %213 = arith.addf %183, %212 : vector<8x64xf32>
    %c0_75 = arith.constant 0 : index
    %c0_76 = arith.constant 0 : index
    %c0_77 = arith.constant 0 : index
    %214 = vector.load %arg16[%c0_75, %c0_76, %c0_77] : memref<1x1x64xf32, #tpu.memory_space<vmem>>, vector<1x1x64xf32>
    %215 = vector.shape_cast %214 : vector<1x1x64xf32> to vector<1x64xf32>
    %c0_78 = arith.constant 0 : index
    %c0_79 = arith.constant 0 : index
    %c0_80 = arith.constant 0 : index
    %216 = vector.load %arg17[%c0_78, %c0_79, %c0_80] : memref<1x1x64xf32, #tpu.memory_space<vmem>>, vector<1x1x64xf32>
    %217 = vector.shape_cast %216 : vector<1x1x64xf32> to vector<1x64xf32>
    %cst_81 = arith.constant dense<0.000000e+00> : vector<8xf32>
    %218 = vector.multi_reduction <add>, %213, %cst_81 [1] : vector<8x64xf32> to vector<8xf32>
    %219 = vector.shape_cast %218 : vector<8xf32> to vector<8x1xf32>
    %cst_82 = arith.constant 6.400000e+01 : f32
    %220 = vector.broadcast %cst_82 : f32 to vector<8x1xf32>
    %221 = arith.divf %219, %220 : vector<8x1xf32>
    %222 = vector.broadcast %221 : vector<8x1xf32> to vector<8x64xf32>
    %223 = arith.subf %213, %222 : vector<8x64xf32>
    %224 = arith.mulf %223, %223 : vector<8x64xf32>
    %cst_83 = arith.constant dense<0.000000e+00> : vector<8xf32>
    %225 = vector.multi_reduction <add>, %224, %cst_83 [1] : vector<8x64xf32> to vector<8xf32>
    %226 = vector.shape_cast %225 : vector<8xf32> to vector<8x1xf32>
    %cst_84 = arith.constant 6.400000e+01 : f32
    %227 = vector.broadcast %cst_84 : f32 to vector<8x1xf32>
    %228 = arith.divf %226, %227 : vector<8x1xf32>
    %229 = vector.broadcast %221 : vector<8x1xf32> to vector<8x64xf32>
    %230 = arith.subf %213, %229 : vector<8x64xf32>
    %cst_85 = arith.constant 9.99999974E-6 : f32
    %231 = vector.broadcast %cst_85 : f32 to vector<8x1xf32>
    %232 = arith.addf %228, %231 : vector<8x1xf32>
    %233 = math.rsqrt %232 : vector<8x1xf32>
    %234 = vector.broadcast %233 : vector<8x1xf32> to vector<8x64xf32>
    %235 = arith.mulf %230, %234 : vector<8x64xf32>
    %236 = vector.broadcast %215 : vector<1x64xf32> to vector<8x64xf32>
    %237 = arith.mulf %235, %236 : vector<8x64xf32>
    %238 = vector.broadcast %217 : vector<1x64xf32> to vector<8x64xf32>
    %239 = arith.addf %237, %238 : vector<8x64xf32>
    %c0_86 = arith.constant 0 : index
    %c0_87 = arith.constant 0 : index
    %240 = vector.load %arg25[%c0_86, %c0_87] : memref<8x64xf32, #tpu.memory_space<vmem>>, vector<8x64xf32>
    tpu.vector_store %arg25[%c0_86, %c0_87], %239 {strides = array<i32>} : memref<8x64xf32, #tpu.memory_space<vmem>>, vector<8x64xf32>,
    %c1_i32 = arith.constant 1 : i32
    %241 = arith.cmpi eq, %arg1, %c1_i32 : i32
    %242 = arith.extui %241 : i1 to i32
    %c0_i32_88 = arith.constant 0 : i32
    %243 = arith.cmpi ne, %242, %c0_i32_88 : i32
    scf.if %243 {
      %c0_89 = arith.constant 0 : index
      %c0_90 = arith.constant 0 : index
      %244 = vector.load %arg18[%c0_89, %c0_90] : memref<64x128xf32, #tpu.memory_space<vmem>>, vector<64x128xf32>
      %cst_91 = arith.constant dense<0.000000e+00> : vector<8x128xf32>
      %245 = tpu.matmul %239, %244, %cst_91 {dimension_numbers = #tpu.dot_dimension_numbers<[1], [0], [0], [1], [0, 0, 1, 1], [], []>} : vector<8x64xf32>, vector<64x128xf32>, vector<8x128xf32> -> vector<8x128xf32>
      %c0_92 = arith.constant 0 : index
      %c0_93 = arith.constant 0 : index
      %246 = vector.load %arg19[%c0_92, %c0_93] : memref<1x128xf32, #tpu.memory_space<vmem>>, vector<1x128xf32>
      %247 = vector.broadcast %246 : vector<1x128xf32> to vector<8x128xf32>
      %248 = arith.addf %245, %247 : vector<8x128xf32>
      %249 = vector.extract_strided_slice %248 {offsets = [0, 0], sizes = [1, 128], strides = [1, 1]} : vector<8x128xf32> to vector<1x128xf32>
      %c0_94 = arith.constant 0 : index
      %c0_95 = arith.constant 0 : index
      %c0_96 = arith.constant 0 : index
      %250 = vector.load %arg22[%c0_94, %c0_95, %c0_96] : memref<1x1x128xf32, #tpu.memory_space<vmem>>, vector<1x1x128xf32>
      %251 = vector.shape_cast %250 : vector<1x1x128xf32> to vector<1x128xf32>
      %252 = vector.shape_cast %249 : vector<1x128xf32> to vector<1x1x128xf32>
      tpu.vector_store %arg22[%c0_94, %c0_95, %c0_96], %252 {strides = array<i32>} : memref<1x1x128xf32, #tpu.memory_space<vmem>>, vector<1x1x128xf32>,
      %253 = arith.index_cast %arg0 : i32 to index
      %254 = memref.load %arg20[%253] : memref<2xi32, #tpu.memory_space<smem>>
      %255 = arith.index_cast %254 : i32 to index
      %256 = memref.load %arg21[%255] : memref<3xf32, #tpu.memory_space<smem>>
      %257 = tpu.iota {dimensions = array<i32: 1>} : vector<1x128xi32>
      %cst_97 = arith.constant dense<0xFF800000> : vector<1xf32>
      %258 = vector.multi_reduction <maximumf>, %249, %cst_97 [1] : vector<1x128xf32> to vector<1xf32>
      %259 = vector.shape_cast %258 : vector<1xf32> to vector<1x1xf32>
      %260 = vector.broadcast %259 : vector<1x1xf32> to vector<1x128xf32>
      %261 = arith.subf %249, %260 : vector<1x128xf32>
      %262 = math.exp %261 : vector<1x128xf32>
      %cst_98 = arith.constant dense<0.000000e+00> : vector<1xf32>
      %263 = vector.multi_reduction <add>, %262, %cst_98 [1] : vector<1x128xf32> to vector<1xf32>
      %264 = vector.shape_cast %263 : vector<1xf32> to vector<1x1xf32>
      %265 = math.log %264 : vector<1x1xf32>
      %266 = vector.broadcast %254 : i32 to vector<1x128xi32>
      %267 = arith.cmpi eq, %257, %266 : vector<1x128xi32>
      %cst_99 = arith.constant 0.000000e+00 : f32
      %268 = vector.broadcast %cst_99 : f32 to vector<1x128xf32>
      %269 = arith.select %267, %261, %268 : vector<1x128xi1>, vector<1x128xf32>
      %cst_100 = arith.constant dense<0.000000e+00> : vector<1xf32>
      %270 = vector.multi_reduction <add>, %269, %cst_100 [1] : vector<1x128xf32> to vector<1xf32>
      %271 = vector.shape_cast %270 : vector<1xf32> to vector<1x1xf32>
      %272 = arith.subf %265, %271 : vector<1x1xf32>
      %273 = vector.broadcast %256 : f32 to vector<1x1xf32>
      %274 = arith.mulf %273, %272 : vector<1x1xf32>
      %c0_101 = arith.constant 0 : index
      %c0_102 = arith.constant 0 : index
      %c0_103 = arith.constant 0 : index
      %275 = vector.load %arg23[%c0_101, %c0_102, %c0_103] : memref<1x1x1xf32, #tpu.memory_space<vmem>>, vector<1x1x1xf32>
      %276 = vector.shape_cast %275 : vector<1x1x1xf32> to vector<1x1xf32>
      %277 = vector.shape_cast %274 : vector<1x1xf32> to vector<1x1x1xf32>
      tpu.vector_store %arg23[%c0_101, %c0_102, %c0_103], %277 {strides = array<i32>} : memref<1x1x1xf32, #tpu.memory_space<vmem>>, vector<1x1x1xf32>,
      %cst_104 = arith.constant 1.000000e+00 : f32
      %278 = vector.broadcast %cst_104 : f32 to vector<1x1xf32>
      %279 = vector.broadcast %256 : f32 to vector<1x1xf32>
      %280 = arith.mulf %279, %278 : vector<1x1xf32>
      %c0_105 = arith.constant 0 : index
      %c0_106 = arith.constant 0 : index
      %c0_107 = arith.constant 0 : index
      %281 = vector.load %arg24[%c0_105, %c0_106, %c0_107] : memref<1x1x1xf32, #tpu.memory_space<vmem>>, vector<1x1x1xf32>
      %282 = vector.shape_cast %281 : vector<1x1x1xf32> to vector<1x1xf32>
      %283 = vector.shape_cast %280 : vector<1x1xf32> to vector<1x1x1xf32>
      tpu.vector_store %arg24[%c0_105, %c0_106, %c0_107], %283 {strides = array<i32>} : memref<1x1x1xf32, #tpu.memory_space<vmem>>, vector<1x1x1xf32>,
    } else {
    }
    return
  }
  func.func @transform_0(%arg0: i32, %arg1: i32) -> (i32, i32, i32) {
    %c0_i32 = arith.constant 0 : i32
    %c0_i32_0 = arith.constant 0 : i32
    %c0_i32_1 = arith.constant 0 : i32
    return %arg0, %c0_i32, %c0_i32_0 : i32, i32, i32
  }
  func.func @transform_1(%arg0: i32, %arg1: i32) -> (i32, i32) {
    %c0_i32 = arith.constant 0 : i32
    %c0_i32_0 = arith.constant 0 : i32
    %c0_i32_1 = arith.constant 0 : i32
    return %c0_i32, %c0_i32_0 : i32, i32
  }
  func.func @transform_2(%arg0: i32, %arg1: i32) -> (i32, i32) {
    %c0_i32 = arith.constant 0 : i32
    %c0_i32_0 = arith.constant 0 : i32
    %c0_i32_1 = arith.constant 0 : i32
    return %c0_i32, %c0_i32_0 : i32, i32
  }
  func.func @transform_3(%arg0: i32, %arg1: i32) -> (i32, i32, i32) {
    %c0_i32 = arith.constant 0 : i32
    %c0_i32_0 = arith.constant 0 : i32
    %c0_i32_1 = arith.constant 0 : i32
    return %arg0, %c0_i32, %c0_i32_0 : i32, i32, i32
  }
  func.func @transform_4(%arg0: i32, %arg1: i32) -> (i32, i32, i32) {
    %c0_i32 = arith.constant 0 : i32
    %c0_i32_0 = arith.constant 0 : i32
    %c0_i32_1 = arith.constant 0 : i32
    return %arg1, %c0_i32, %c0_i32_0 : i32, i32, i32
  }
  func.func @transform_5(%arg0: i32, %arg1: i32) -> (i32, i32, i32) {
    %c0_i32 = arith.constant 0 : i32
    %c0_i32_0 = arith.constant 0 : i32
    %c0_i32_1 = arith.constant 0 : i32
    return %arg1, %c0_i32, %c0_i32_0 : i32, i32, i32
  }
  func.func @transform_6(%arg0: i32, %arg1: i32) -> (i32, i32, i32) {
    %c0_i32 = arith.constant 0 : i32
    %c0_i32_0 = arith.constant 0 : i32
    %c0_i32_1 = arith.constant 0 : i32
    return %arg1, %c0_i32, %c0_i32_0 : i32, i32, i32
  }
  func.func @transform_7(%arg0: i32, %arg1: i32) -> (i32, i32, i32) {
    %c0_i32 = arith.constant 0 : i32
    %c0_i32_0 = arith.constant 0 : i32
    %c0_i32_1 = arith.constant 0 : i32
    return %arg1, %c0_i32, %c0_i32_0 : i32, i32, i32
  }
  func.func @transform_8(%arg0: i32, %arg1: i32) -> (i32, i32, i32) {
    %c0_i32 = arith.constant 0 : i32
    %c0_i32_0 = arith.constant 0 : i32
    %c0_i32_1 = arith.constant 0 : i32
    return %arg1, %c0_i32, %c0_i32_0 : i32, i32, i32
  }
  func.func @transform_9(%arg0: i32, %arg1: i32) -> (i32, i32, i32) {
    %c0_i32 = arith.constant 0 : i32
    %c0_i32_0 = arith.constant 0 : i32
    %c0_i32_1 = arith.constant 0 : i32
    return %arg1, %c0_i32, %c0_i32_0 : i32, i32, i32
  }
  func.func @transform_10(%arg0: i32, %arg1: i32) -> (i32, i32, i32) {
    %c0_i32 = arith.constant 0 : i32
    %c0_i32_0 = arith.constant 0 : i32
    %c0_i32_1 = arith.constant 0 : i32
    return %arg1, %c0_i32, %c0_i32_0 : i32, i32, i32
  }
  func.func @transform_11(%arg0: i32, %arg1: i32) -> (i32, i32, i32) {
    %c0_i32 = arith.constant 0 : i32
    %c0_i32_0 = arith.constant 0 : i32
    %c0_i32_1 = arith.constant 0 : i32
    return %arg1, %c0_i32, %c0_i32_0 : i32, i32, i32
  }
  func.func @transform_12(%arg0: i32, %arg1: i32) -> (i32, i32, i32) {
    %c0_i32 = arith.constant 0 : i32
    %c0_i32_0 = arith.constant 0 : i32
    %c0_i32_1 = arith.constant 0 : i32
    return %arg1, %c0_i32, %c0_i32_0 : i32, i32, i32
  }
  func.func @transform_13(%arg0: i32, %arg1: i32) -> (i32, i32, i32) {
    %c0_i32 = arith.constant 0 : i32
    %c0_i32_0 = arith.constant 0 : i32
    %c0_i32_1 = arith.constant 0 : i32
    return %arg1, %c0_i32, %c0_i32_0 : i32, i32, i32
  }
  func.func @transform_14(%arg0: i32, %arg1: i32) -> (i32, i32, i32) {
    %c0_i32 = arith.constant 0 : i32
    %c0_i32_0 = arith.constant 0 : i32
    %c0_i32_1 = arith.constant 0 : i32
    return %arg1, %c0_i32, %c0_i32_0 : i32, i32, i32
  }
  func.func @transform_15(%arg0: i32, %arg1: i32) -> (i32, i32, i32) {
    %c0_i32 = arith.constant 0 : i32
    %c0_i32_0 = arith.constant 0 : i32
    %c0_i32_1 = arith.constant 0 : i32
    return %arg1, %c0_i32, %c0_i32_0 : i32, i32, i32
  }
  func.func @transform_16(%arg0: i32, %arg1: i32) -> (i32, i32) {
    %c0_i32 = arith.constant 0 : i32
    %c0_i32_0 = arith.constant 0 : i32
    %c0_i32_1 = arith.constant 0 : i32
    return %c0_i32, %c0_i32_0 : i32, i32
  }
  func.func @transform_17(%arg0: i32, %arg1: i32) -> (i32, i32) {
    %c0_i32 = arith.constant 0 : i32
    %c0_i32_0 = arith.constant 0 : i32
    %c0_i32_1 = arith.constant 0 : i32
    return %c0_i32, %c0_i32_0 : i32, i32
  }
  func.func @transform_18(%arg0: i32, %arg1: i32) -> i32 {
    %c0_i32 = arith.constant 0 : i32
    %c0_i32_0 = arith.constant 0 : i32
    return %c0_i32 : i32
  }
  func.func @transform_19(%arg0: i32, %arg1: i32) -> i32 {
    %c0_i32 = arith.constant 0 : i32
    %c0_i32_0 = arith.constant 0 : i32
    return %c0_i32 : i32
  }
  func.func @transform_20(%arg0: i32, %arg1: i32) -> (i32, i32, i32) {
    %c0_i32 = arith.constant 0 : i32
    %c0_i32_0 = arith.constant 0 : i32
    %c0_i32_1 = arith.constant 0 : i32
    return %arg0, %c0_i32, %c0_i32_0 : i32, i32, i32
  }
  func.func @transform_21(%arg0: i32, %arg1: i32) -> (i32, i32, i32) {
    %c0_i32 = arith.constant 0 : i32
    %c0_i32_0 = arith.constant 0 : i32
    %c0_i32_1 = arith.constant 0 : i32
    return %arg0, %c0_i32, %c0_i32_0 : i32, i32, i32
  }
  func.func @transform_22(%arg0: i32, %arg1: i32) -> (i32, i32, i32) {
    %c0_i32 = arith.constant 0 : i32
    %c0_i32_0 = arith.constant 0 : i32
    %c0_i32_1 = arith.constant 0 : i32
    return %arg0, %c0_i32, %c0_i32_0 : i32, i32, i32
  }
}

</mosaic_0001>

<bundles_post_ra>
// kernel: bert_classifier_forward.1
= control target key start
LH: loop header
LB: loop body
LE: loop exit
PB: predicated region body
PF: predicated region fallthrough
CT: control target
= control target key end

     0   :  { %s3510_s0 = inlined_call_operand.vmem [shape: f32[2,8,64], index: 0, kind: input, shape index: {}]   ;;  %s3511_s1 = inlined_call_operand.vmem [shape: f32[1,64], index: 1, kind: input, shape index: {}]   ;;  %s3512_s2 = inlined_call_operand.vmem [shape: f32[1,64], index: 2, kind: input, shape index: {}]   ;;  %s3513_s3 = inlined_call_operand.vmem [shape: f32[2,1,8], index: 3, kind: input, shape index: {}]   ;;  %s3514_s4 = inlined_call_operand.vmem [shape: bf16[2,64,192], index: 4, kind: input, shape index: {}]   ;;  %s3515_s5 = inlined_call_operand.vmem [shape: f32[2,1,192], index: 5, kind: input, shape index: {}]   ;;  %s3516_s6 = inlined_call_operand.vmem [shape: bf16[2,64,64], index: 6, kind: input, shape index: {}]   ;;  %s3517_s7 = inlined_call_operand.vmem [shape: f32[2,1,64], index: 7, kind: input, shape index: {}]   ;;  %s3518_s8 = inlined_call_operand.vmem [shape: f32[2,1,64], index: 8, kind: input, shape index: {}]   ;;  %s3519_s9 = inlined_call_operand.vmem [shape: f32[2,1,64], index: 9, kind: input, shape index: {}]   ;;  %s3520_s10 = inlined_call_operand.vmem [shape: bf16[2,64,128], index: 10, kind: input, shape index: {}]   ;;  %s3521_s11 = inlined_call_operand.vmem [shape: f32[2,1,128], index: 11, kind: input, shape index: {}]   ;;  %s3522_s12 = inlined_call_operand.vmem [shape: bf16[2,128,64], index: 12, kind: input, shape index: {}]   ;;  %s3523_s13 = inlined_call_operand.vmem [shape: f32[2,1,64], index: 13, kind: input, shape index: {}]   ;;  %s3524_s14 = inlined_call_operand.vmem [shape: f32[2,1,64], index: 14, kind: input, shape index: {}]   ;;  %s3525_s15 = inlined_call_operand.vmem [shape: f32[2,1,64], index: 15, kind: input, shape index: {}]   ;;  %s3526_s16 = inlined_call_operand.vmem [shape: f32[64,128], index: 16, kind: input, shape index: {}]   ;;  %s3527_s17 = inlined_call_operand.hbm [shape: f32[1,128], index: 17, kind: input, shape index: {}]   ;;  %s3528_s18 = inlined_call_operand.vmem [shape: s32[2], index: 18, kind: input, shape index: {}]   ;;  %s3529_s19 = inlined_call_operand.vmem [shape: f32[3], index: 19, kind: input, shape index: {}]   ;;  %s3530_s20 = inlined_call_operand.hbm [shape: f32[2,1,128], index: 20, kind: output, shape index: {0}]   ;;  %s3531_s21 = inlined_call_operand.vmem [shape: f32[2,1,1], index: 21, kind: output, shape index: {1}]   ;;  %s3532_s22 = inlined_call_operand.vmem [shape: f32[2,1,1], index: 22, kind: output, shape index: {2}]  }
   0x1   :  { %3553 = sst [smem:[#allocation29_spill]] %s3510_s0 }
   0x2   :  { %3554 = sst [smem:[#allocation30_spill]] %s3511_s1 }
   0x3   :  { %3555 = sst [smem:[#allocation31_spill]] %s3512_s2 }
   0x4   :  { %3556 = sst [smem:[#allocation32_spill]] %s3513_s3 }
   0x5   :  { %3557 = sst [smem:[#allocation33_spill]] %s3514_s4 }
   0x6   :  { %3558 = sst [smem:[#allocation34_spill]] %s3515_s5 }
   0x7   :  { %3559 = sst [smem:[#allocation35_spill]] %s3516_s6 }
   0x8   :  { %3560 = sst [smem:[#allocation36_spill]] %s3519_s9 }
   0x9   :  { %3561 = sst [smem:[#allocation37_spill]] %s3520_s10 }
   0xa   :  { %3562 = sst [smem:[#allocation38_spill]] %s3521_s11 }
   0xb   :  { %3563 = sst [smem:[#allocation39_spill]] %s3522_s12 }
   0xc   :  { %3564 = sst [smem:[#allocation40_spill]] %s3525_s15 }
   0xd   :  { %3565 = sst [smem:[#allocation41_spill]] %s3526_s16 }
   0xe   :  { %3566 = sst [smem:[#allocation42_spill]] %s3527_s17 }
   0xf   :  { %3567 = sst [smem:[#allocation43_spill]] %s3528_s18 }
  0x10   :  { %3568 = sst [smem:[#allocation44_spill]] %s3529_s19 }
  0x11   :  { %3569 = sst [smem:[#allocation45_spill]] %s3530_s20 }
  0x12   :  { %3570 = sst [smem:[#allocation46_spill]] %s3531_s21 }
  0x13   :  { %3571 = sst [smem:[#allocation47_spill]] %s3532_s22 }
  0x14   :  { %28 = vsyncpa [#allocation4], 0 }
  0x15   :  { %29 = vsyncpa [#allocation6], 0 }
  0x16   :  { %30 = vsyncpa [#allocation9], 0 }
  0x17   :  { %31 = vsyncpa [#allocation5], 0 }
  0x18   :  { %33 = vsyncpa [#allocation5 + $0x1], 0  ;;  %s3022_s3 = smov 0   ;;  %s3024_s28 = smov 0  }
  0x19   :  { %s3026_s29 = smov 0   ;;  %s3028_s30 = smov 0  }
  0x1a   :  { %s3030_s4 = smov 0   ;;  %s3032_s0 = smov 0  }
  0x1b   :  { %s3034_s23 = smov 0   ;;  %s3036_s1 = smov 0  }
  0x1c LB: > { %3572 = sst [smem:[#allocation15_spill]] %s2866_s3  ;;  %s2334_s5 = sadd.s32 4294967295, %s2894_s1   ;;  %s2894_s1 = sphi %s3036_s1, %s39_s1   ;;  %s2890_s23 = sphi %s3034_s23, %s3642_s23   ;;  %s2886_s0 = sphi %s3032_s0, %s3645_s0   ;;  %s2882_s4 = sphi %s3030_s4, %s3640_s4   ;;  %s2878_s30 = sphi %s3028_s30, %s3639_s30   ;;  %s2874_s29 = sphi %s3026_s29, %s3638_s29   ;;  %s2870_s28 = sphi %s3024_s28, %s3644_s28   ;;  %s2866_s3 = sphi %s3022_s3, %s3643_s3  }
  0x1d   : > { %3573 = sst [smem:[#allocation16_spill]] %s2874_s29  ;;  %s2335_s24 = sadd.s32 4294967294, %s2894_s1  }
  0x1e   : > { %3574 = sst [smem:[#allocation17_spill]] %s2878_s30  ;;  %s48_s6 = sadd.s32 1, %s2886_s0 }
  0x1f   : > { %3575 = sst [smem:[#allocation18_spill]] %s2882_s4  ;;  %s51_s25 = sadd.s32 1, %s2890_s23 }
  0x20   : > { %3576 = sst [smem:[#allocation19_spill]] %s2886_s0  ;;  %p49_p0 = scmp.ge.s32.totalorder %s48_s6, 2 }
  0x21   : > { %3577 = sst [smem:[#allocation20_spill]] %s2890_s23  ;;  %s548_s26 = sadd.s32 1, %s2874_s29 }
  0x22   : > { %3578 = sst [smem:[#allocation21_spill]] %s2894_s1  ;;  %p558_p1 = scmp.ne.s32.totalorder %s2874_s29, %s2870_s28 }
  0x23   : > { %p559_p2 = scmp.eq.s32.totalorder %s2334_s5, 3  ;;  %s3647_s6 = smov (%p49_p0, %s48_s6), 0 }
  0x24   : > { %3579 = sst [smem:[#allocation22_spill]] %s3647_s6  ;;  %s3649_s25 = smov (!%p49_p0, %s51_s25), %s2890_s23 }
  0x25   : > { %p3072_p3 = por %p559_p2, %p558_p1  ;;  %p564_p4 = scmp.ne.s32.totalorder %s2870_s28, %s2866_s3 }
  0x26   : > { %p53_p5 = scmp.ge.s32.totalorder %s3649_s25, 2  ;;  %p565_p6 = scmp.eq.s32.totalorder %s2335_s24, 3 }
  0x27   : > { %s3580_s2 = scalar_select %p3072_p3, 1, 0 }
  0x28   : > { %p2336_p7 = scmp.ge.s32.totalorder %s2894_s1, 1  ;;  %p624_p8 = scmp.lt.s32.totalorder %s2894_s1, 5 }
  0x29   : > { %3581 = sst [smem:[#allocation23_spill]] %s3580_s2  ;;  %s3651_s25 = smov (%p53_p5, %s3649_s25), 0 }
  0x2a   : > { %3582 = sst [smem:[#allocation24_spill]] %s3651_s25  ;;  %p3082_p9 = por %p565_p6, %p564_p4 }
  0x2b   : > { %p3086_p10 = pnand %p2336_p7, %p624_p8  ;;  %s545_s6 = ssub.s32 %s2890_s23, %s3651_s25 }
  0x2c   : > { %s3583_s27 = scalar_select %p3082_p9, 1, 0 }
  0x2d   : > { %s3585_s0 = scalar_select %p3086_p10, 1, 0 }
  0x2e   : > { %3584 = sst [smem:[#allocation25_spill]] %s3583_s27  ;;  %p546_p11 = scmp.eq.s32.totalorder %s545_s6, 0 }
  0x2f   : > { %p2583_p12 = pneg %p3086_p10  ;;  %p3094_p13 = scmp.eq.s32.totalorder %s2334_s5, 0 }
  0x30   : > { %s3099_s3 = scalar_select %p546_p11, %s2874_s29, %s548_s26  }
  0x31   : > { %s3586_s24 = scalar_select %p3094_p13, 1, 0 }
  0x32   : > { %3587 = sst [smem:[#allocation26_spill]] %s3099_s3  ;;  %s2896_s1 = smov [#allocation3]  }
  0x33   : > { %s646_s20 = sshll.u32 %s2896_s1, 4  ;;  %p3103_p0 = pnand %p3094_p13, %p2583_p12  ;;  %s647_s20 = int_to_ptr.vmem [resolvable:$true] %s646_s20 }
  0x34   : > { %s3589_s18 = sld [smem:[#allocation43_spill]]  ;;  %s2745_s23 = scalar_lea.vmem %s647_s20, 16 }
  0x35   : > { %p2736_p1 = pneg %p3103_p0  ;;  %p2746_p2 = scmp.ne.s32.totalorder %s647_s20, %s2745_s23 }
  0x36   : > { %s2752_s1 = scalar_lea.vmem %s647_s20, 32  ;;  %p2753_p6 = scmp.lt.s32.totalorder %s647_s20, %s647_s20 }
  0x37   : > { %p2748_p4 = pnand %p2746_p2, %p2736_p1  ;;  %p2754_p7 = scmp.lt.s32.totalorder %s2752_s1, %s2745_s23 }
  0x39   : > { %p2749_p5 = pneg %p2748_p4  ;;  %p2755_p8 = por %p2754_p7, %p2753_p6 }
  0x3a   : > { %s657_s5 = sshll.u32 %s3589_s18, 4  ;;  %s658_s5 = int_to_ptr.vmem [resolvable:$true] %s657_s5 }
  0x3b   : > { %p2756_p11 = pnand %p2755_p8, %p2749_p5 }
  0x3d   : > { %2759 = shalt.err (!%p2756_p11)
}
  0x3e   : > { %s3590_s17 = sld [smem:[#allocation42_spill]]  ;;  %s2760_s29 = scalar_lea.vmem %s658_s5, 16 }
  0x3f   : > { %s3591_s19 = sld [smem:[#allocation44_spill]]  ;;  %p2761_p12 = scmp.ne.s32.totalorder %s658_s5, %s2760_s29 }
  0x40   : > { %p2768_p6 = scmp.lt.s32.totalorder %s658_s5, %s658_s5  ;;  %p2769_p5 = scmp.lt.s32.totalorder %s2760_s29, %s2760_s29 }
  0x41   : > { %p2763_p2 = pnand %p2761_p12, %p2736_p1 }
  0x42   : > { %p2770_p7 = por %p2769_p5, %p2768_p6 }
  0x43   : > { %p2764_p4 = pneg %p2763_p2 }
  0x44   : > { %2586 = dma.hbm_to_vmem [thread:$0]  (!%p3103_p0), %s3590_s17, 16, %s647_s20, [#allocation4]  }
  0x45   : > { %s668_s3 = sshll.u32 %s3591_s19, 4  ;;  %p2771_p8 = pnand %p2770_p7, %p2764_p4  ;;  %s669_s3 = int_to_ptr.vmem [resolvable:$true] %s668_s3 }
  0x47   : > { %2774 = shalt.err (!%p2771_p8)
}
  0x48   : > { %s2897_s23 = smov [#allocation7]   ;;  %s2775_s20 = scalar_lea.vmem %s669_s3, 16 }
  0x49   : > { %2589 = dma.vmem_to_smem (!%p3103_p0), %s658_s5, 16, %s2897_s23, [#allocation6]  }
  0x4a   : > { %p2776_p11 = scmp.ne.s32.totalorder %s669_s3, %s2775_s20  ;;  %p2783_p13 = scmp.lt.s32.totalorder %s669_s3, %s669_s3 }
  0x4b   : > { %p2784_p12 = scmp.lt.s32.totalorder %s2775_s20, %s2775_s20 }
  0x4c   : > { %p2778_p9 = pnand %p2776_p11, %p2736_p1 }
  0x4d   : > { %p2785_p2 = por %p2784_p12, %p2783_p13 }
  0x4e   : > { %p2779_p3 = pneg %p2778_p9 }
  0x50   : > { %p2786_p10 = pnand %p2785_p2, %p2779_p3 }
  0x52   : > { %2789 = shalt.err (!%p2786_p10)
}
  0x53   : > { %s2898_s18 = smov [#allocation8]   ;;  %p3592_p4 = scmp.ne.s32.totalorder %s3585_s0, 0 }
  0x54   : > { %2592 = dma.vmem_to_smem (!%p3103_p0), %s669_s3, 16, %s2898_s18, [#allocation9]  }
  0x55   : > { %775 = sbr.rel (%p3592_p4) target bundleno = 3817 (0xee9), region = 100 }
  0x5a   : > { %p3593_p6 = scmp.ne.s32.totalorder %s3586_s24, 0 }
  0x5c   : > { %2849 = dma.done.wait (%p3593_p6), [#allocation4], 16  }
  0x5d   : > { %2851 = vsyncadd (%p3593_p6), [#allocation4], 4294967280 }
  0x5e   : > { %2853 = dma.done.wait (%p3593_p6), [#allocation6], 16  }
  0x5f   : > { %2855 = vsyncadd (%p3593_p6), [#allocation6], 4294967280 }
  0x60   : > { %2857 = dma.done.wait (%p3593_p6), [#allocation9], 16  }
  0x61   : > { %2859 = vsyncadd (%p3593_p6), [#allocation9], 4294967280 }
  0x62   : > { %789 = sfence }
  0x63   : > { %p898_p3 = scmp.lt.s32.totalorder %s2882_s4, 1  ;;  %p905_p9 = scmp.lt.s32.totalorder %s2878_s30, 1 }
  0x64   : > { %s3595_s23 = sld [smem:[#allocation29_spill]] }
  0x65   : > { %s3151_s29 = scalar_select %p898_p3, %s2882_s4, 1 }
  0x66   : > { %s3154_s0 = scalar_select %p905_p9, %s2878_s30, 1 }
  0x67   : > { %s2345_s27 = sshll.u32 %s3151_s29, 3  ;;  %s3596_s19 = sld [smem:[#allocation33_spill]] }
  0x68   : > { %s2410_s18 = sshll.u32 %s3154_s0, 6  ;;  %s2348_s4 = sshll.u32 %s3154_s0, 1 }
  0x69   : > { %s3598_s24 = sld [smem:[#allocation34_spill]]  ;;  %s2411_s1 = sshll.u32 %s3154_s0, 5 }
  0x6a   : > { %s901_s20 = scalar_lea.vmem %s3595_s23, %s2345_s27  ;;  %s3599_s6 = sld [smem:[#allocation35_spill]] }
  0x6b   : > { %s3602_s10 = sld [smem:[#allocation37_spill]]  ;;  %s946_s16 = scalar_lea.vmem %s3524_s14, %s3154_s0 }
  0x6c   : > { %s3604_s12 = sld [smem:[#allocation39_spill]] }
  0x6d   : > { %s3168_s2 = scalar_lea.vmem %s3596_s19, %s2410_s18  ;;  %s3606_s25 = sld [smem:[#allocation46_spill]] }
  0x6e   : > { %3597 = sst [smem:[#allocation27_spill]] %s3168_s2  ;;  %s943_s2 = scalar_lea.vmem %s3523_s13, %s3154_s0 }
  0x6f   : > { %s3174_s5 = scalar_lea.vmem %s3598_s24, %s2348_s4  ;;  %s3605_s4 = sld [smem:[#allocation40_spill]] }
  0x70   : > { %s3180_s27 = scalar_lea.vmem %s3599_s6, %s2411_s1  ;;  %s3609_s3 = sld [smem:[#allocation17_spill]] }
  0x71   : > { %3600 = sst [smem:[#allocation28_spill]] %s3180_s27  ;;  %s3197_s24 = scalar_lea.vmem %s3602_s10, %s2411_s1 }
  0x72   : > { %s3206_s23 = scalar_lea.vmem %s3604_s12, %s2410_s18  ;;  %s3607_s18 = sld [smem:[#allocation47_spill]] }
  0x73   : > { %s952_s6 = scalar_lea.vmem %s3606_s25, %s3151_s29  ;;  %s3608_s12 = sand.u32 1, %s2870_s28  }
  0x74   : > { %s3230_s9 = scalar_lea.vmem [#allocation10], %s3608_s12 }
  0x75   : > { %s949_s17 = scalar_lea.vmem %s3605_s4, %s3154_s0 }
  0x76   : > { %p2355_p10 = scmp.ne.s32.totalorder %s3609_s3, 0 }
  0x77   : > { %s3610_s12 = sld [smem:[#allocation30_spill]] (!%p2355_p10) }
  0x78   : > { %s955_s22 = scalar_lea.vmem %s3607_s18, %s3151_s29  ;;  %960 = sbr.rel (%p2355_p10) target bundleno = 435 (0x1b3), region = 116 }
  0x79   : > { %s3611_s15 = sld [smem:[#allocation31_spill]] (!%p2355_p10) }
  0x7d   : > { %v961_v0 = vld [vmem:[%s901_s20] sm:$0xff]  ;;  %vm964_vm0 = vcmask 523264  }
  0x7e   : > { %v965_v1 = vsel %vm964_vm0, %v961_v0, 0.0  ;;  %v2356_v11 = vld [vmem:[%s3610_s12] ss:$0 sm:$0xff] }
  0x7f   : > { %966 = vadd.xlane.f32.xlu0 %v965_v1  ;;  %v2357_v13 = vld [vmem:[%s3611_s15] ss:$0 sm:$0xff] }
 0x108   : > { %v967_v2 = vpop.xlane.xlu0 %966 }
 0x109   : > { %v969_v3 = vmul.f32 0.015625, %v967_v2 }
 0x10b   : > { %v970_v4 = vsub.f32 %v961_v0, %v969_v3 }
 0x10d   : > { %v971_v5 = vmul.f32 %v970_v4, %v970_v4 }
 0x10f   : > { %v972_v6 = vsel %vm964_vm0, %v971_v5, 0.0 }
 0x110   : > { %973 = vadd.xlane.f32.xlu0 %v972_v6 }
 0x199   : > { %v974_v7 = vpop.xlane.xlu0 %973 }
 0x19a   : > { %v975_v8 = vmul.f32 0.015625, %v974_v7 }
 0x19c   : > { %v976_v9 = vadd.f32 1e-05, %v975_v8 }
 0x19e   : > { %2678 = vrsqrt.f32 %v976_v9 }
 0x1ab   : > { %v2679_v10 = vpop.eup %2678 }
 0x1ac   : > { %v978_v12 = vmul.f32 %v2679_v10, %v970_v4 }
 0x1ae   : > { %v985_v14 = vmul.f32 %v2356_v11, %v978_v12 }
 0x1b0   : > { %v992_v15 = vadd.f32 %v2357_v13, %v985_v14 }
 0x1b2   : > { %993 = vst.msk [vmem:[#allocation2] sm:$0xff] %vm964_vm0, %v992_v15 }
 0x1b3 PF: > { %s3612_s21 = sld [smem:[#allocation27_spill]]  ;;  %v2899_v18 = vmov 0   ;;  %vm1059_vm1 = vcmask 523264   ;;  %v2900_v27 = vmov 0.0   ;;  %v1009_v28 = vlaneseq  ;;  %v1007_v32 = vld [vmem:[%s3174_s5] sm:$0x3]  ;;  %s3616_s3 = scalar_lea.vmem %s3517_s7, %s3154_s0 }
 0x1b4   : > { %1095 = vmatprep.mubr.bf16.mxu1 %v2899_v18  ;;  %2470 = vmatprep.subr.bf16.mxu0 %v2900_v27  ;;  %vm2901_vm4 = vmmov 0   ;;  %s2902_s5 = smov 64   ;;  %vm1255_vm13 = vcmask 1043456   ;;  %s3613_s4 = sld [smem:[#allocation32_spill]]  ;;  %v2903_v7 = vmov -1e+09  }
 0x1b5   : > { %v3257_v29 = vshrl.u32 %v1009_v28, 7  ;;  %v3259_v30 = vand.u32 127, %v1009_v28  ;;  %2472 = vmatprep.mubr.msk.bf16.mxu0 %vm2901_vm4, %v2900_v27  ;;  %vm1171_vm15 = vcmask 64512   ;;  %s3615_s25 = sld [smem:[#allocation28_spill]]  ;;  %s3617_s12 = scalar_lea.vmem %s3518_s8, %s3154_s0 }
 0x1b6   : > { %s3620_s30 = sld [smem:[#allocation38_spill]] }
 0x1b7   : > { %v1011_v31 = vsub.s32 0, %v3257_v29  ;;  %vm1186_vm2 = vcmp.ge.s32.totalorder %v3259_v30, 16  ;;  %vm1187_vm3 = vcmp.lt.s32.totalorder %v3259_v30, 32  ;;  %vm1345_vm5 = vcmp.ge.s32.totalorder %v3259_v30, 32 }
 0x1b8   : > { %vm1346_vm6 = vcmp.lt.s32.totalorder %v3259_v30, 48  ;;  %v1015_v33 = vsub.s32 1, %v3257_v29  ;;  %vm1458_vm7 = vcmp.ge.s32.totalorder %v3259_v30, 48  ;;  %vm1459_vm8 = vcmp.lt.s32.totalorder %v3259_v30, 64  ;;  %vm1188_vm9 = vmand %vm1186_vm2, %vm1187_vm3 }
 0x1b9   : > { %v2680_v16 = vld [vmem:[%s3612_s21 + $0x34] ss:$8 sps:$4 sm:$0xff]   ;;  %v2682_v17 = vld [vmem:[%s3612_s21 + $0x30] ss:$8 sps:$4 sm:$0xff]   ;;  %v2683_v19 = vld [vmem:[%s3612_s21 + $0x24] ss:$8 sps:$4 sm:$0xff]   ;;  %v1012_v34 = vrot.slane %v1007_v32, %v1011_v31 }
 0x1ba   : > { %1071 = vmatprep.subr.bf16.mxu1 %v2680_v16  ;;  %v2685_v20 = vld [vmem:[%s3612_s21 + $0x20] ss:$8 sps:$4 sm:$0xff]   ;;  %v2686_v21 = vld [vmem:[%s3612_s21 + $0x14] ss:$8 sps:$4 sm:$0xff]   ;;  %v2688_v22 = vld [vmem:[%s3612_s21 + $0x10] ss:$8 sps:$4 sm:$0xff]   ;;  %v1016_v35 = vrot.slane %v1007_v32, %v1015_v33  ;;  %s3614_s26 = scalar_lea.vmem %s3613_s4, %s3151_s29 }
 0x1bb   : > { %1072 = vmatpush1.bf16.msra.mxu1 %v2682_v17  ;;  %v2689_v23 = vld [vmem:[%s3612_s21 + $0x4] ss:$8 sps:$4 sm:$0xff]   ;;  %v2691_v24 = vld [vmem:[%s3612_s21] ss:$8 sps:$4 sm:$0xff]   ;;  %vm1108_vm10 = vcmp.lt.s32.totalorder %v3259_v30, 16  ;;  %vm1347_vm11 = vmand %vm1345_vm5, %vm1346_vm6  ;;  %v2369_v37 = vsel %vm1188_vm9, 1.0, %v2900_v27 }
 0x1bc   : > { %1073 = vmatprep.subr.bf16.mxu1 %v2683_v19  ;;  %v3250_v25 = vld [vmem:[#allocation2] sm:$0xff]  ;;  %vm1460_vm12 = vmand %vm1458_vm7, %vm1459_vm8  ;;  %v2367_v38 = vsel %vm1108_vm10, 1.0, %v2900_v27  ;;  %v2373_v40 = vsel %vm1347_vm11, 1.0, %v2900_v27  ;;  %s3621_s1 = scalar_lea.vmem %s3620_s30, %s3154_s0 }
 0x1bd   : > { %v998_v26 = vpack.c.bf16 %v3250_v25, %v3250_v25  ;;  %v2376_v41 = vsel %vm1460_vm12, 1.0, %v2900_v27  ;;  %v995_v3 = vld [vmem:[%s3614_s26] sm:$0x1] }
 0x1be   : > { %vm996_vm14 = vcmp.gt.f32.partialorder %v995_v3, 0.0 }
 0x1bf   : > { %1074 = vmatpush1.bf16.msra.mxu1 %v2685_v20  ;;  %v997_v8 = vsel %vm996_vm14, 0.0, %v2903_v7 }
 0x1c0   : > { %1075 = vmatprep.subr.bf16.mxu1 %v2686_v21  ;;  %v1168_v11 = vrot.slane %v997_v8, %v1011_v31 }
 0x1c3   : > { %1076 = vmatpush1.bf16.msra.mxu1 %v2688_v22 }
 0x1c4   : > { %1077 = vmatprep.subr.bf16.mxu1 %v2689_v23 }
 0x1c7   : > { %1078 = vmatpush1.bf16.msra.mxu1 %v2691_v24 }
 0x1c8   : > { %2458 = vmatprep.subr.bf16.mxu1 %v2900_v27 }
 0x1ca   : > { %2366 = vmatmul.mubr.msk.bf16.vlgmr.msra.gmra.mxu1 %vm1059_vm1, %v998_v26 }
 0x1cb   : > { %2460 = vmatprep.mubr.msk.bf16.mxu1 %vm2901_vm4, %v2900_v27 }
 0x28a   : > { %v1097_v36 = vpop.f32.mrf.mxu1 }
 0x28b   : > { %v1098_v39 = vadd.f32 %v1097_v36, %v1012_v34 }
 0x28c   : > { %v1099_v42 = vpop.f32.mrf.mxu1 }
 0x28d   : > { %v1100_v43 = vadd.f32 %v1099_v42, %v1016_v35  ;;  %v1106_v44 = vpack.c.bf16 %v1098_v39, %v1098_v39  ;;  %v1191_v45 = vmul.f32 %v2369_v37, %v1098_v39  ;;  %v1112_v46 = vmul.f32 %v2367_v38, %v1098_v39 }
 0x28e   : > { %v1101_v47 = vpop.f32.mrf.mxu1  ;;  %v3281_v48 = vmul.f32 %v2373_v40, %v1098_v39  ;;  %v3283_v49 = vmul.f32 %v2376_v41, %v1098_v39 }
 0x28f   : > { %1115 = vrot.lane.b32.xlu0 %v1106_v44, %s2902_s5  ;;  %v1250_v50 = vmul.f32 %v2369_v37, %v1100_v43  ;;  %v1184_v51 = vmul.f32 %v2367_v38, %v1100_v43  ;;  %v1409_v53 = vmul.f32 %v2373_v40, %v1100_v43  ;;  %v1522_v54 = vmul.f32 %v2376_v41, %v1100_v43 }
 0x290   : > { %v1102_v52 = vpop.f32.mrf.mxu1  ;;  %v1113_v1 = vpack.c.bf16 %v1112_v46, %v1112_v46  ;;  %v1192_v2 = vpack.c.bf16 %v1191_v45, %v1191_v45  ;;  %v1351_v33 = vpack.c.bf16 %v3281_v48, %v3281_v48  ;;  %v1464_v34 = vpack.c.bf16 %v3283_v49, %v3283_v49 }
 0x291   : > { %v1251_v55 = vpack.c.bf16 %v1250_v50, %v1250_v50  ;;  %v1185_v56 = vpack.c.bf16 %v1184_v51, %v1184_v51  ;;  %v1410_v57 = vpack.c.bf16 %v1409_v53, %v1409_v53  ;;  %v1523_v58 = vpack.c.bf16 %v1522_v54, %v1522_v54 }
 0x293   : > { %v1257_v59 = vsel %vm1255_vm13, %v1251_v55, 0  ;;  %v1303_v60 = vsel %vm1255_vm13, %v1185_v56, 0  ;;  %v3285_v61 = vsel %vm1255_vm13, %v1410_v57, 0  ;;  %v3287_v62 = vsel %vm1255_vm13, %v1523_v58, 0 }
 0x294   : > { %2471 = vmatpush3.bf16.msra.mxu0 %v1257_v59 }
 0x295   : > { %2482 = vmatprep.subr.bf16.mxu0 %v2900_v27 }
 0x301   : > { %v1116_v63 = vpop.permute.xlu0 %1115 }
 0x302   : > { %v1121_v0 = vsel %vm1059_vm1, %v1116_v63, 0 }
 0x303   : > { %2459 = vmatpush3.bf16.xpose.msra.mxu1 %v1121_v0 }
 0x304   : > { %2464 = vmatprep.subr.bf16.mxu1 %v2900_v27 }
 0x30a   : > { %2461 = vmatmul.mubr.msk.bf16.vlgmr.msra.gmra.mxu1 %vm1059_vm1, %v1113_v1 }
 0x30b   : > { %2465 = vmatpush3.bf16.xpose.msra.mxu1 %v1121_v0  ;;  %2466 = vmatprep.mubr.msk.bf16.mxu1 %vm2901_vm4, %v2900_v27 }
 0x30c   : > { %2476 = vmatprep.subr.bf16.mxu1 %v2900_v27 }
 0x312   : > { %2467 = vmatmul.mubr.msk.bf16.vlgmr.msra.gmra.mxu1 %vm1059_vm1, %v1192_v2 }
 0x313   : > { %2477 = vmatpush3.bf16.msra.mxu1 %v1303_v60  ;;  %2478 = vmatprep.mubr.msk.bf16.mxu1 %vm2901_vm4, %v2900_v27 }
 0x314   : > { %2488 = vmatprep.subr.bf16.mxu1 %v2900_v27 }
 0x3ca   : > { %v1157_v4 = vpop.f32.mrf.mxu1 }
 0x3cb   : > { %v1163_v21 = vmul.f32 0.25, %v1157_v4 }
 0x3cc   : > { %v2462_v5 = vpop.f32.mrf.mxu1 }
 0x3cd   : > { %v1170_v24 = vadd.f32 %v1168_v11, %v1163_v21 }
 0x3ce   : > { %v1160_v6 = vpop.f32.mrf.mxu1 }
 0x3cf   : > { %v1172_v26 = vsel %vm1171_vm15, %v1170_v24, -inf }
 0x3d0   : > { %v2463_v9 = vpop.f32.mrf.mxu1 }
 0x3d2   : > { %v1230_v10 = vpop.f32.mrf.mxu1 }
 0x3d3   : > { %v1236_v12 = vmul.f32 0.25, %v1230_v10  ;;  %v2692_v10 = vld [vmem:[%s3615_s25 + $0x18] sm:$0xff]  }
 0x3d4   : > { %v2468_v13 = vpop.f32.mrf.mxu1 }
 0x3d5   : > { %v1237_v14 = vadd.f32 %v1236_v12, %v1168_v11 }
 0x3d6   : > { %v1233_v15 = vpop.f32.mrf.mxu1 }
 0x3d7   : > { %v1238_v16 = vsel %vm1171_vm15, %v1237_v14, -inf }
 0x3d8   : > { %1239 = vmax.xlane.f32.xlu0 %v1238_v16  ;;  %v2469_v17 = vpop.f32.mrf.mxu1 }
 0x461   : > { %v1240_v18 = vpop.xlane.xlu0 %1239 }
 0x462   : > { %v1241_v19 = vsub.f32 %v1237_v14, %v1240_v18 }
 0x464   : > { %v1242_v20 = vmul.f32 1.442695, %v1241_v19 }
 0x466   : > { %2708 = vpow2.f32 %v1242_v20 }
 0x473   : > { %v2709_v22 = vpop.eup %2708 }
 0x474   : > { %v1244_v23 = vsel %vm1171_vm15, %v2709_v22, 0.0 }
 0x475   : > { %1245 = vadd.xlane.f32.xlu1 %v1244_v23  ;;  %v2695_v23 = vld [vmem:[%s3615_s25] sm:$0xff]  }
 0x479   : > { %1173 = vmax.xlane.f32.xlu1 %v1172_v26 }
 0x4fe   : > { %v1246_v28 = vpop.xlane.xlu1 %1245 }
 0x4ff   : > { %2710 = vrcp.f32 %v1246_v28 }
 0x502   : > { %v1174_v35 = vpop.xlane.xlu1 %1173 }
 0x503   : > { %v1175_v37 = vsub.f32 %v1170_v24, %v1174_v35 }
 0x505   : > { %v1176_v40 = vmul.f32 1.442695, %v1175_v37 }
 0x507   : > { %2712 = vpow2.f32 %v1176_v40  ;;  %v2379_v40 = vld [vmem:[%s3616_s3] ss:$0 sm:$0xff]  ;;  %s3623_s3 = sld [smem:[#allocation17_spill]] }
 0x50c   : > { %v2711_v29 = vpop.eup %2710 }
 0x50d   : > { %v1248_v31 = vmul.f32 %v2711_v29, %v2709_v22  ;;  %v2693_v22 = vld [vmem:[%s3615_s25 + $0x10] sm:$0xff]   ;;  %p2404_p13 = scmp.ne.s32.totalorder %s3623_s3, 1 }
 0x50e   : > { %s3625_s4 = sld [smem:[#allocation18_spill]] (!%p2404_p13) }
 0x50f   : > { %v1249_v32 = vpack.c.bf16 %v1248_v31, %v1248_v31 }
 0x511   : > { %2473 = vmatmul.mubr.msk.bf16.vlgmr.msra.gmra.mxu0 %vm1171_vm15, %v1249_v32 }
 0x512   : > { %2483 = vmatpush3.bf16.xpose.msra.mxu0 %v1121_v0  ;;  %2484 = vmatprep.mubr.msk.bf16.mxu0 %vm2901_vm4, %v2900_v27 }
 0x513   : > { %2494 = vmatprep.subr.bf16.mxu0 %v2900_v27 }
 0x514   : > { %v2713_v55 = vpop.eup %2712 }
 0x515   : > { %v1178_v57 = vsel %vm1171_vm15, %v2713_v55, 0.0 }
 0x519   : > { %2485 = vmatmul.mubr.msk.bf16.vlgmr.msra.gmra.mxu0 %vm1059_vm1, %v1351_v33 }
 0x51a   : > { %2495 = vmatpush3.bf16.xpose.msra.mxu0 %v1121_v0  ;;  %2496 = vmatprep.mubr.msk.bf16.mxu0 %vm2901_vm4, %v2900_v27 }
 0x51b   : > { %2506 = vmatprep.subr.bf16.mxu0 %v2900_v27 }
 0x521   : > { %2497 = vmatmul.mubr.msk.bf16.vlgmr.msra.gmra.mxu0 %vm1059_vm1, %v1464_v34 }
 0x522   : > { %2514 = vmatprep.mubr.msk.bf16.mxu0 %vm2901_vm4, %v2900_v27  ;;  %2507 = vmatpush3.bf16.msra.mxu0 %v2692_v10  ;;  %v2707_v10 = vld [vmem:[%s3206_s23] sm:$0xff]  }
 0x523   : > { %2508 = vmatprep.subr.bf16.mxu0 %v2900_v27 }
 0x526   : > { %2509 = vmatpush3.bf16.msra.mxu0 %v2693_v22 }
 0x527   : > { %2510 = vmatprep.subr.bf16.mxu0 %v2900_v27 }
 0x5d1   : > { %v3325_v36 = vpop.f32.mrf.mxu0 }
 0x5d3   : > { %v2474_v38 = vpop.f32.mrf.mxu0 }
 0x5d5   : > { %v1296_v39 = vpop.f32.mrf.mxu0 }
 0x5d7   : > { %v2475_v41 = vpop.f32.mrf.mxu0 }
 0x5d9   : > { %v1389_v42 = vpop.f32.mrf.mxu0 }
 0x5da   : > { %v1395_v43 = vmul.f32 0.25, %v1389_v42 }
 0x5db   : > { %v2486_v44 = vpop.f32.mrf.mxu0 }
 0x5dc   : > { %v1396_v45 = vadd.f32 %v1395_v43, %v1168_v11 }
 0x5dd   : > { %v1392_v46 = vpop.f32.mrf.mxu0 }
 0x5de   : > { %v1397_v47 = vsel %vm1171_vm15, %v1396_v45, -inf }
 0x5df   : > { %1398 = vmax.xlane.f32.xlu1 %v1397_v47  ;;  %v2487_v48 = vpop.f32.mrf.mxu0 }
 0x5e1   : > { %v1502_v49 = vpop.f32.mrf.mxu0 }
 0x5e2   : > { %v1508_v50 = vmul.f32 0.25, %v1502_v49 }
 0x5e3   : > { %v2498_v51 = vpop.f32.mrf.mxu0 }
 0x5e4   : > { %v1509_v52 = vadd.f32 %v1508_v50, %v1168_v11 }
 0x5e5   : > { %v1505_v53 = vpop.f32.mrf.mxu0 }
 0x5e6   : > { %v1510_v54 = vsel %vm1171_vm15, %v1509_v52, -inf  ;;  %v2698_v53 = vld [vmem:[%s3197_s24 + $0x8] sm:$0xff]  }
 0x5e7   : > { %1511 = vmax.xlane.f32.xlu1 %v1510_v54  ;;  %v2499_v56 = vpop.f32.mrf.mxu0  ;;  %v2699_v54 = vld [vmem:[%s3197_s24] sm:$0xff]  }
 0x5eb   : > { %1179 = vadd.xlane.f32.xlu1 %v1178_v57 }
 0x668   : > { %v1399_v58 = vpop.xlane.xlu1 %1398 }
 0x669   : > { %v1400_v59 = vsub.f32 %v1396_v45, %v1399_v58 }
 0x66b   : > { %v1401_v60 = vmul.f32 1.442695, %v1400_v59  ;;  %v2385_v59 = vld [vmem:[%s3617_s12] ss:$0 sm:$0xff]  ;;  %s3624_s12 = sld [smem:[#allocation41_spill]] (!%p2404_p13) }
 0x66d   : > { %2714 = vpow2.f32 %v1401_v60 }
 0x670   : > { %v1512_v63 = vpop.xlane.xlu1 %1511 }
 0x671   : > { %v1513_v0 = vsub.f32 %v1509_v52, %v1512_v63  ;;  %v2696_v52 = vld [vmem:[%s3197_s24 + $0x18] sm:$0xff]  }
 0x673   : > { %v1514_v1 = vmul.f32 1.442695, %v1513_v0 }
 0x674   : > { %v1180_v2 = vpop.xlane.xlu1 %1179 }
 0x675   : > { %2716 = vpow2.f32 %v1514_v1 }
 0x676   : > { %2718 = vrcp.f32 %v1180_v2 }
 0x67a   : > { %v2715_v3 = vpop.eup %2714 }
 0x67b   : > { %v1403_v4 = vsel %vm1171_vm15, %v2715_v3, 0.0 }
 0x67c   : > { %1404 = vadd.xlane.f32.xlu1 %v1403_v4  ;;  %v2701_v4 = vld [vmem:[%s3206_s23 + $0x30] sm:$0xff]  }
 0x682   : > { %v2717_v5 = vpop.eup %2716 }
 0x683   : > { %v2719_v6 = vpop.eup %2718  ;;  %v1516_v7 = vsel %vm1171_vm15, %v2717_v5, 0.0 }
 0x684   : > { %1517 = vadd.xlane.f32.xlu1 %v1516_v7  ;;  %v1182_v8 = vmul.f32 %v2719_v6, %v2713_v55  ;;  %v2703_v6 = vld [vmem:[%s3206_s23 + $0x20] sm:$0xff]   ;;  %v2704_v7 = vld [vmem:[%s3206_s23 + $0x18] sm:$0xff]  }
 0x686   : > { %v1183_v9 = vpack.c.bf16 %v1182_v8, %v1182_v8  ;;  %v2705_v8 = vld [vmem:[%s3206_s23 + $0x10] sm:$0xff]  }
 0x688   : > { %2479 = vmatmul.mubr.msk.bf16.vlgmr.msra.gmra.mxu1 %vm1171_vm15, %v1183_v9  ;;  %v2706_v9 = vld [vmem:[%s3206_s23 + $0x8] sm:$0xff]  }
 0x689   : > { %2489 = vmatpush3.bf16.msra.mxu1 %v3285_v61  ;;  %2490 = vmatprep.mubr.msk.bf16.mxu1 %vm2901_vm4, %v2900_v27 }
 0x68a   : > { %2500 = vmatprep.subr.bf16.mxu1 %v2900_v27 }
 0x705   : > { %v1405_v11 = vpop.xlane.xlu1 %1404 }
 0x706   : > { %2720 = vrcp.f32 %v1405_v11  ;;  %v2387_v11 = vld [vmem:[%s3621_s1] ss:$0 sm:$0xff] }
 0x70d   : > { %v1518_v12 = vpop.xlane.xlu1 %1517 }
 0x70e   : > { %2722 = vrcp.f32 %v1518_v12 }
 0x713   : > { %v2721_v13 = vpop.eup %2720 }
 0x714   : > { %v1407_v14 = vmul.f32 %v2721_v13, %v2715_v3  ;;  %v2700_v3 = vld [vmem:[%s3206_s23 + $0x38] sm:$0xff]  }
 0x716   : > { %v1408_v15 = vpack.c.bf16 %v1407_v14, %v1407_v14 }
 0x718   : > { %2491 = vmatmul.mubr.msk.bf16.vlgmr.msra.gmra.mxu1 %vm1171_vm15, %v1408_v15 }
 0x719   : > { %2501 = vmatpush3.bf16.msra.mxu1 %v3287_v62  ;;  %2502 = vmatprep.mubr.msk.bf16.mxu1 %vm2901_vm4, %v2900_v27  ;;  %v2694_v62 = vld [vmem:[%s3615_s25 + $0x8] sm:$0xff]   ;;  %s2013_s25 = sld [smem:[#allocation7 + %s3625_s4]] (!%p2404_p13) }
 0x71a   : > { %2518 = vmatprep.subr.bf16.mxu1 %v2900_v27  ;;  %2511 = vmatpush3.bf16.msra.mxu0 %v2694_v62 }
 0x71b   : > { %v2723_v61 = vpop.eup %2722  ;;  %2512 = vmatprep.subr.bf16.mxu0 %v2900_v27 }
 0x71c   : > { %v1520_v16 = vmul.f32 %v2723_v61, %v2717_v5  ;;  %v2702_v5 = vld [vmem:[%s3206_s23 + $0x28] sm:$0xff]  }
 0x71e   : > { %v1521_v17 = vpack.c.bf16 %v1520_v16, %v1520_v16  ;;  %2513 = vmatpush3.bf16.msra.mxu0 %v2695_v23 }
 0x71f   : > { %2530 = vmatprep.subr.bf16.mxu0 %v2900_v27  ;;  %s2014_s27 = sld [smem:[#allocation8 + %s2013_s25]] (!%p2404_p13) }
 0x720   : > { %2503 = vmatmul.mubr.msk.bf16.vlgmr.msra.gmra.mxu1 %vm1171_vm15, %v1521_v17 }
 0x721   : > { %2526 = vmatprep.mubr.msk.bf16.mxu1 %vm2901_vm4, %v2900_v27  ;;  %2519 = vmatpush3.bf16.msra.mxu1 %v2696_v52 }
 0x722   : > { %2520 = vmatprep.subr.bf16.mxu1 %v2900_v27 }
 0x748   : > { %v1339_v18 = vpop.f32.mrf.mxu1 }
 0x749   : > { %v1340_v29 = vadd.f32 %v1339_v18, %v3325_v36 }
 0x74a   : > { %v2480_v19 = vpop.f32.mrf.mxu1 }
 0x74c   : > { %v1342_v20 = vpop.f32.mrf.mxu1 }
 0x74e   : > { %v2481_v21 = vpop.f32.mrf.mxu1 }
 0x7d8   : > { %v1451_v24 = vpop.f32.mrf.mxu1 }
 0x7d9   : > { %v1457_v32 = vadd.f32 %v1451_v24, %v1340_v29  ;;  %v2393_v24 = vld [vmem:[%s943_s2] ss:$0 sm:$0xff] }
 0x7da   : > { %v2492_v26 = vpop.f32.mrf.mxu1 }
 0x7dc   : > { %v1454_v28 = vpop.f32.mrf.mxu1 }
 0x7de   : > { %v2493_v31 = vpop.f32.mrf.mxu1 }
 0x7e0   : > { %v1564_v33 = vpop.f32.mrf.mxu1 }
 0x7e1   : > { %v1570_v34 = vadd.f32 %v1564_v33, %v1457_v32 }
 0x7e2   : > { %v2504_v35 = vpop.f32.mrf.mxu1 }
 0x7e3   : > { %v1571_v37 = vpack.c.bf16 %v1570_v34, %v1570_v34 }
 0x7e4   : > { %v1567_v38 = vpop.f32.mrf.mxu1 }
 0x7e5   : > { %2515 = vmatmul.mubr.msk.bf16.vlgmr.msra.gmra.mxu0 %vm1059_vm1, %v1571_v37 }
 0x7e6   : > { %v2505_v39 = vpop.f32.mrf.mxu1  ;;  %2546 = vmatprep.mubr.msk.bf16.mxu0 %vm2901_vm4, %v2900_v27  ;;  %2531 = vmatpush3.bf16.msra.mxu0 %v2700_v3 }
 0x7e7   : > { %2532 = vmatprep.subr.bf16.mxu0 %v2900_v27 }
 0x7ea   : > { %2533 = vmatpush3.bf16.msra.mxu0 %v2701_v4 }
 0x7eb   : > { %2534 = vmatprep.subr.bf16.mxu0 %v2900_v27 }
 0x7ee   : > { %2535 = vmatpush3.bf16.msra.mxu0 %v2702_v5 }
 0x7ef   : > { %2536 = vmatprep.subr.bf16.mxu0 %v2900_v27 }
 0x7f2   : > { %2537 = vmatpush3.bf16.msra.mxu0 %v2703_v6 }
 0x7f3   : > { %2538 = vmatprep.subr.bf16.mxu0 %v2900_v27 }
 0x7f6   : > { %2539 = vmatpush3.bf16.msra.mxu0 %v2704_v7 }
 0x7f7   : > { %2540 = vmatprep.subr.bf16.mxu0 %v2900_v27 }
 0x7fa   : > { %2541 = vmatpush3.bf16.msra.mxu0 %v2705_v8 }
 0x7fb   : > { %2542 = vmatprep.subr.bf16.mxu0 %v2900_v27 }
 0x7fe   : > { %2543 = vmatpush3.bf16.msra.mxu0 %v2706_v9 }
 0x7ff   : > { %2544 = vmatprep.subr.bf16.mxu0 %v2900_v27 }
 0x802   : > { %2545 = vmatpush3.bf16.msra.mxu0 %v2707_v10 }
 0x8a5   : > { %v1648_v36 = vpop.f32.mrf.mxu0 }
 0x8a6   : > { %v1649_v41 = vadd.f32 %v2379_v40, %v1648_v36 }
 0x8a7   : > { %v2516_v42 = vpop.f32.mrf.mxu0 }
 0x8a8   : > { %v1654_v43 = vadd.f32 %v1649_v41, %v3250_v25  ;;  %v2697_v25 = vld [vmem:[%s3197_s24 + $0x10] sm:$0xff]   ;;  %s3618_s24 = sld [smem:[#allocation36_spill]] }
 0x8a9   : > { %v1651_v44 = vpop.f32.mrf.mxu0  ;;  %2521 = vmatpush3.bf16.msra.mxu1 %v2697_v25 }
 0x8aa   : > { %v1657_v45 = vsel %vm1059_vm1, %v1654_v43, 0.0  ;;  %2522 = vmatprep.subr.bf16.mxu1 %v2900_v27  ;;  %v2402_v44 = vld [vmem:[%s946_s16] ss:$0 sm:$0xff] }
 0x8ab   : > { %1658 = vadd.xlane.f32.xlu1 %v1657_v45  ;;  %v2517_v46 = vpop.f32.mrf.mxu0 }
 0x8ac   : > { %v2403_v46 = vld [vmem:[%s949_s17] ss:$0 sm:$0xff] }
 0x8ad   : > { %2523 = vmatpush3.bf16.msra.mxu1 %v2698_v53 }
 0x8ae   : > { %2524 = vmatprep.subr.bf16.mxu1 %v2900_v27  ;;  %s3619_s15 = scalar_lea.vmem %s3618_s24, %s3154_s0 }
 0x8af   : > { %v2386_v63 = vld [vmem:[%s3619_s15] ss:$0 sm:$0xff] }
 0x8b1   : > { %2525 = vmatpush3.bf16.msra.mxu1 %v2699_v54 }
 0x934   : > { %v1659_v47 = vpop.xlane.xlu1 %1658 }
 0x935   : > { %v1661_v48 = vmul.f32 0.015625, %v1659_v47 }
 0x937   : > { %v1662_v49 = vsub.f32 %v1654_v43, %v1661_v48 }
 0x939   : > { %v1663_v50 = vmul.f32 %v1662_v49, %v1662_v49 }
 0x93b   : > { %v1664_v51 = vsel %vm1059_vm1, %v1663_v50, 0.0 }
 0x93c   : > { %1665 = vadd.xlane.f32.xlu1 %v1664_v51 }
 0x9c5   : > { %v1666_v55 = vpop.xlane.xlu1 %1665 }
 0x9c6   : > { %v1667_v56 = vmul.f32 0.015625, %v1666_v55 }
 0x9c8   : > { %v1668_v57 = vadd.f32 1e-05, %v1667_v56 }
 0x9ca   : > { %2724 = vrsqrt.f32 %v1668_v57 }
 0x9d7   : > { %v2725_v58 = vpop.eup %2724 }
 0x9d8   : > { %v1670_v60 = vmul.f32 %v2725_v58, %v1662_v49 }
 0x9da   : > { %v1677_v0 = vmul.f32 %v2385_v59, %v1670_v60 }
 0x9dc   : > { %v1684_v1 = vadd.f32 %v2386_v63, %v1677_v0 }
 0x9de   : > { %v1685_v2 = vpack.c.bf16 %v1684_v1, %v1684_v1 }
 0x9e0   : > { %2527 = vmatmul.mubr.msk.bf16.vlgmr.msra.gmra.mxu1 %vm1059_vm1, %v1685_v2 }
 0xaa0   : > { %v1762_v12 = vpop.f32.mrf.mxu1 }
 0xaa1   : > { %v1763_v13 = vadd.f32 %v2387_v11, %v1762_v12 }
 0xaa2   : > { %v2528_v14 = vpop.f32.mrf.mxu1 }
 0xaa3   : > { %v1768_v15 = vmul.f32 %v1763_v13, %v1763_v13 }
 0xaa4   : > { %v1765_v61 = vpop.f32.mrf.mxu1 }
 0xaa5   : > { %v1769_v16 = vmul.f32 %v1768_v15, %v1763_v13 }
 0xaa6   : > { %v2529_v17 = vpop.f32.mrf.mxu1 }
 0xaa7   : > { %v1770_v18 = vmul.f32 0.044715, %v1769_v16 }
 0xaa9   : > { %v1771_v19 = vadd.f32 %v1770_v18, %v1763_v13 }
 0xaab   : > { %v1772_v20 = vmul.f32 0.7978846, %v1771_v19 }
 0xaad   : > { %2726 = vtanh.f32 %v1772_v20 }
 0xaba   : > { %v2727_v21 = vpop.eup %2726 }
 0xabb   : > { %v1774_v27 = vadd.f32 1.0, %v2727_v21 }
 0xabd   : > { %v1775_v22 = vmul.f32 0.5, %v1774_v27 }
 0xabf   : > { %v1776_v62 = vmul.f32 %v1775_v22, %v1763_v13 }
 0xac1   : > { %v1777_v23 = vpack.c.bf16 %v1776_v62, %v1776_v62 }
 0xac3   : > { %2547 = vmatmul.mubr.bf16.vlgmr.msra.gmra.mxu0 %v1777_v23 }
 0xb83   : > { %v1883_v26 = vpop.f32.mrf.mxu0 }
 0xb84   : > { %v1884_v28 = vadd.f32 %v2393_v24, %v1883_v26 }
 0xb85   : > { %v2548_v29 = vpop.f32.mrf.mxu0 }
 0xb86   : > { %v1889_v31 = vadd.f32 %v1884_v28, %v1684_v1 }
 0xb87   : > { %v1886_v32 = vpop.f32.mrf.mxu0 }
 0xb88   : > { %v1892_v33 = vsel %vm1059_vm1, %v1889_v31, 0.0 }
 0xb89   : > { %1893 = vadd.xlane.f32.xlu0 %v1892_v33  ;;  %v2549_v34 = vpop.f32.mrf.mxu0 }
 0xc12   : > { %v1894_v35 = vpop.xlane.xlu0 %1893 }
 0xc13   : > { %v1895_v37 = vmul.f32 0.015625, %v1894_v35 }
 0xc15   : > { %v1896_v38 = vsub.f32 %v1889_v31, %v1895_v37 }
 0xc17   : > { %v1897_v39 = vmul.f32 %v1896_v38, %v1896_v38 }
 0xc19   : > { %v1898_v40 = vsel %vm1059_vm1, %v1897_v39, 0.0 }
 0xc1a   : > { %1899 = vadd.xlane.f32.xlu1 %v1898_v40 }
 0xca3   : > { %v1900_v36 = vpop.xlane.xlu1 %1899 }
 0xca4   : > { %v1901_v41 = vmul.f32 0.015625, %v1900_v36 }
 0xca6   : > { %v1902_v42 = vadd.f32 1e-05, %v1901_v41 }
 0xca8   : > { %2728 = vrsqrt.f32 %v1902_v42 }
 0xcb5   : > { %v2729_v43 = vpop.eup %2728 }
 0xcb6   : > { %v1904_v45 = vmul.f32 %v2729_v43, %v1896_v38 }
 0xcb8   : > { %v1911_v47 = vmul.f32 %v2402_v44, %v1904_v45  ;;  %1923 = sbr.rel (%p2404_p13) target bundleno = 3790 (0xece), region = 120 }
 0xcba   : > { %v1918_v48 = vadd.f32 %v2403_v46, %v1911_v47 }
 0xcbc   : > { %1919 = vst.msk [vmem:[#allocation2] sm:$0xff] %vm1059_vm1, %v1918_v48 }
 0xcbd   : > { %v1931_v49 = vld [vmem:[%s3624_s12 + $0x38] sm:$0xff]  ;;  %v2904_v50 = vmov 0.0   ;;  %v1930_v51 = vld [vmem:[%s3624_s12 + $0x30] sm:$0xff]  ;;  %vm2905_vm0 = vmmov 0   ;;  %v1929_v52 = vld [vmem:[%s3624_s12 + $0x28] sm:$0xff]  ;;  %vm2015_vm2 = vcmask 1040384   ;;  %v2027_v0 = vstv %s2013_s25 }
 0xcbe   : > { %2550 = vmatprep.subr.mxu0 %v2904_v50  ;;  %2566 = vmatprep.mubr.msk.f32.mxu0 %vm2905_vm0, %v2904_v50  ;;  %v1928_v25 = vld [vmem:[%s3624_s12 + $0x20] sm:$0xff]  ;;  %v1927_v53 = vld [vmem:[%s3624_s12 + $0x18] sm:$0xff]  ;;  %v1926_v54 = vld [vmem:[%s3624_s12 + $0x10] sm:$0xff]  ;;  %vm2028_vm3 = vcmp.eq.s32.totalorder %v3259_v30, %v2027_v0  ;;  %v2034_v8 = vstv %s2014_s27 }
 0xcbf   : > { %2551 = vmatpush3.msra.mxu0 %v1931_v49  ;;  %v1925_v55 = vld [vmem:[%s3624_s12 + $0x8] sm:$0xff]  ;;  %v1924_v56 = vld [vmem:[%s3624_s12] sm:$0xff] }
 0xcc0   : > { %2552 = vmatprep.subr.mxu0 %v2904_v50  ;;  %v2405_v57 = vld [vmem:[#allocation3] ss:$0 sm:$0xff] }
 0xcc1   : > { %2553 = vmatpush3.msra.mxu0 %v1930_v51 }
 0xcc2   : > { %2554 = vmatprep.subr.mxu0 %v2904_v50 }
 0xcc3   : > { %2555 = vmatpush3.msra.mxu0 %v1929_v52 }
 0xcc4   : > { %2556 = vmatprep.subr.mxu0 %v2904_v50 }
 0xcc5   : > { %2557 = vmatpush3.msra.mxu0 %v1928_v25 }
 0xcc6   : > { %2558 = vmatprep.subr.mxu0 %v2904_v50 }
 0xcc7   : > { %2559 = vmatpush3.msra.mxu0 %v1927_v53 }
 0xcc8   : > { %2560 = vmatprep.subr.mxu0 %v2904_v50 }
 0xcc9   : > { %2561 = vmatpush3.msra.mxu0 %v1926_v54 }
 0xcca   : > { %2562 = vmatprep.subr.mxu0 %v2904_v50 }
 0xccb   : > { %2563 = vmatpush3.msra.mxu0 %v1925_v55 }
 0xccc   : > { %2564 = vmatprep.subr.mxu0 %v2904_v50 }
 0xccd   : > { %2565 = vmatpush3.msra.mxu0 %v1924_v56 }
 0xcce   : > { %2567 = vmatmul.mubr.msk.f32.vlgmr.msra.gmra.mxu0 %vm1059_vm1, %v1918_v48  ;;  %vm2036_vm1 = vcmask 0  }
 0xccf   : > { %2038 = vst.msk [vmem:[%s955_s22] sm:$0x1] %vm2036_vm1, %v2034_v8 }
 0xd8e   : > { %v2008_v58 = vpop.f32.mrf.mxu0 }
 0xd8f   : > { %v2009_v59 = vadd.f32 %v2405_v57, %v2008_v58 }
 0xd90   : > { %v2568_v60 = vpop.f32.mrf.mxu0 }
 0xd91   : > { %2012 = vst [vmem:[%s3230_s9] sm:$0x1] %v2009_v59  ;;  %v2016_v63 = vsel %vm2015_vm2, %v2009_v59, -inf }
 0xd92   : > { %2017 = vmax.xlane.f32.xlu0 %v2016_v63 }
 0xe1b   : > { %v2018_v1 = vpop.xlane.xlu0 %2017 }
 0xe1c   : > { %v2019_v2 = vsub.f32 %v2009_v59, %v2018_v1 }
 0xe1e   : > { %v2020_v3 = vmul.f32 1.442695, %v2019_v2  ;;  %v2029_v4 = vsel %vm2028_vm3, %v2019_v2, 0.0 }
 0xe1f   : > { %v2030_v5 = vsel %vm2015_vm2, %v2029_v4, 0.0 }
 0xe20   : > { %2730 = vpow2.f32 %v2020_v3  ;;  %2031 = vadd.xlane.f32.xlu1 %v2030_v5 }
 0xe2d   : > { %v2731_v6 = vpop.eup %2730 }
 0xe2e   : > { %v2022_v7 = vsel %vm2015_vm2, %v2731_v6, 0.0 }
 0xe2f   : > { %2023 = vadd.xlane.f32.xlu0 %v2022_v7 }
 0xea9   : > { %v2032_v11 = vpop.xlane.xlu1 %2031 }
 0xeb8   : > { %v2024_v30 = vpop.xlane.xlu0 %2023 }
 0xeb9   : > { %2732 = vlog2.f32 %v2024_v30 }
 0xec6   : > { %v2733_v9 = vpop.eup %2732 }
 0xec7   : > { %v2026_v10 = vmul.f32 0.6931472, %v2733_v9 }
 0xec9   : > { %v2033_v12 = vsub.f32 %v2026_v10, %v2032_v11 }
 0xecb   : > { %v2035_v13 = vmul.f32 %v2034_v8, %v2033_v12 }
 0xecd   : > { %2037 = vst.msk [vmem:[%s952_s6] sm:$0x1] %vm2036_vm1, %v2035_v13 }
 0xece PF: > { %s3628_s0 = sld [smem:[#allocation18_spill]]  ;;  %s2058_s5 = sshll.u32 %s3230_s9, 4  ;;  %s2059_s5 = int_to_ptr.vmem [resolvable:$true] %s2058_s5 }
 0xecf   : > { %s3629_s17 = sld [smem:[#allocation23_spill]]  ;;  %s3631_s30 = sand.u32 1, %s2870_s28  }
 0xed0   : > { %s3630_s15 = sld [smem:[#allocation45_spill]]  ;;  %s2040_s1 = scalar_lea.sflag [#allocation5], %s3631_s30 }
 0xed1   : > { %s2790_s23 = scalar_lea.vmem %s2059_s5, 16  ;;  %s2906_s29 = smov [#allocation10]  }
 0xed2   : > { %p2791_p0 = scmp.ne.s32.totalorder %s2059_s5, %s2790_s23  ;;  %s2794_s6 = sshll.u32 %s2906_s29, 4  ;;  %s2795_s6 = int_to_ptr.vmem [resolvable:$false] %s2794_s6 }
 0xed3   : > { %s2796_s4 = scalar_lea.vmem %s2795_s6, 32  ;;  %p2797_p8 = scmp.lt.s32.totalorder %s2059_s5, %s2795_s6 }
 0xed4   : > { %s2407_s19 = sshll.u32 %s3628_s0, 4  ;;  %p2798_p11 = scmp.lt.s32.totalorder %s2796_s4, %s2790_s23 }
 0xed5   : > { %p3632_p1 = scmp.ne.s32.totalorder %s3629_s17, 0 }
 0xed6   : > { %s2056_s21 = scalar_lea.hbm %s3630_s15, %s2407_s19  ;;  %p2799_p12 = por %p2798_p11, %p2797_p8 }
 0xed7   : > { %p2792_p5 = pnand %p2791_p0, %p3632_p1 }
 0xed9   : > { %p2793_p7 = pneg %p2792_p5 }
 0xedb   : > { %p2800_p2 = pnand %p2799_p12, %p2793_p7 }
 0xedd   : > { %2803 = shalt.err (!%p2800_p2)
}
 0xede   : > { %s2804_s2 = scalar_lea.hbm %s2056_s21, 16  ;;  %s2808_s25 = scalar_lea.hbm %s3630_s15, 32 }
 0xedf   : > { %p2805_p4 = scmp.ne.s32.totalorder %s2056_s21, %s2804_s2  ;;  %p2809_p9 = scmp.lt.s32.totalorder %s2056_s21, %s3630_s15 }
 0xee0   : > { %p2810_p10 = scmp.lt.s32.totalorder %s2808_s25, %s2804_s2 }
 0xee1   : > { %p2806_p6 = pnand %p2805_p4, %p3632_p1 }
 0xee2   : > { %p2811_p13 = por %p2810_p10, %p2809_p9 }
 0xee3   : > { %p2807_p3 = pneg %p2806_p6 }
 0xee5   : > { %p2812_p0 = pnand %p2811_p13, %p2807_p3 }
 0xee7   : > { %2815 = shalt.err (!%p2812_p0)
}
 0xee8   : > { %2581 = dma.vmem_to_hbm [thread:$0]  (%p3632_p1), %s2059_s5, 16, %s2056_s21, %s2040_s1  }
 0xee9 PF: > { %s3633_s3 = sld [smem:[#allocation21_spill]] }
 0xeea   : > { %s3634_s10 = sld [smem:[#allocation15_spill]] }
 0xeeb   : > { %s3635_s11 = sld [smem:[#allocation25_spill]] }
 0xeef   : > { %p2603_p5 = scmp.ge.s32.totalorder %s3633_s3, 2 }
 0xef0   : > { %s2076_s16 = sand.u32 1, %s3634_s10  }
 0xef1   : > { %p3636_p7 = scmp.ne.s32.totalorder %s3635_s11, 0  ;;  %s2077_s20 = scalar_lea.sflag [#allocation5], %s2076_s16 }
 0xef3   : > { %p2594_p8 = pnand %p2603_p5, %p3636_p7 }
 0xef5   : > { %p2595_p11 = pneg %p2594_p8 }
 0xef7   : > { %2861 = dma.done.wait (%p2595_p11), %s2077_s20, 16  }
 0xef8   : > { %2863 = vsyncadd (%p2595_p11), %s2077_s20, 4294967280  ;;  %s39_s1 = sadd.s32 1, %s3633_s3   ;;  %s3637_s0 = sld [smem:[#allocation16_spill]] }
 0xef9   : > { %p36_p12 = scmp.ge.s32.totalorder %s39_s1, 6   ;;  %s3638_s29 = sld [smem:[#allocation26_spill]] }
 0xefa   : > { %s3639_s30 = sld [smem:[#allocation19_spill]]  ;;  %s3643_s3 = smov %s2870_s28 }
 0xefb   : > { %s3640_s4 = sld [smem:[#allocation20_spill]] }
 0xefc   : > { %s3641_s17 = sld [smem:[#allocation22_spill]] }
 0xefd   : > { %s3642_s23 = sld [smem:[#allocation24_spill]] }
 0xefe   : > { %s3644_s28 = smov %s3637_s0  ;;  %38 = sbr.rel (!%p36_p12) target bundleno = 28 (0x1c), region = 220 }
 0xf02   : > { %s3645_s0 = smov %s3641_s17 }
 0xf03   :  { %2093 = vsyncpa [#allocation4], 1 }
 0xf04   :  { %2095 = vsyncpa [#allocation4 + $0x1], 1 }
 0xf05   :  { %2096 = vsyncpa [#allocation5], 1 }
 0xf06   :  { %2098 = vsyncpa [#allocation5 + $0x1], 1 }
 0xf07   :  { %2099 = vsyncpa [#allocation6], 1 }
 0xf08   :  { %2101 = vsyncpa [#allocation6 + $0x1], 1 }
 0xf09   :  { %2102 = vsyncpa [#allocation9], 1 }

</bundles_post_ra>
